<compile_context>
chip_gen: v7x
topology: tpu7x:2x2x1
jax: 0.10.0
libtpu: 0.0.40
codegen_flags: <defaults>
</compile_context>

<pallas_src>
import functools

import jax
import jax.numpy as jnp
from jax.experimental import pallas as pl
from jax.experimental.pallas import tpu as pltpu

_BN_EPS = 1e-5


def _context_kernel(x_ref, w_ref, o_ref, pad_ref, patch_ref, *, H, W, C, B, PAD):
    """Fused ContextModule for B batch elements.

    x_ref     : (B, C, H*W)         input activations (NCHW, spatial flattened)
    w_ref     : (3, C, 9*C + 1)     bf16 folded weights (inconv, up|down, down2);
                                    last column is the folded BN bias.
    o_ref     : (B, C, H*W)         output activations
    pad_ref   : (C, H*W + 2*PAD)    f32 lane-padded line buffer (VMEM scratch)
    patch_ref : (9*C + 1, B*H*W)    bf16 im2col patch (+ constant ones row)
    """
    HW = H * W
    half = C // 2
    f32 = jnp.float32
    bf16 = jnp.bfloat16

    # Zero the lane halos once (interior is rewritten per conv).  The halos
    # absorb the dy = +/-1 row-boundary reads, so no row masks are needed.
    pad_ref[:, 0:PAD] = jnp.zeros((C, PAD), f32)
    pad_ref[:, PAD + HW:PAD + HW + PAD] = jnp.zeros((C, PAD), f32)

    # Constant all-ones patch row -> bias folded into the matmul (K = 9*C+1).
    patch_ref[9 * C:9 * C + 1, :] = jnp.ones((1, B * HW), bf16)

    # Column-boundary masks, pre-broadcast (no per-use broadcast_in_dim).
    col = jax.lax.broadcasted_iota(jnp.int32, (1, HW), 1) % W
    mask_l = jnp.broadcast_to((col >= 1).astype(f32), (C, HW))       # dx = -1
    mask_r = jnp.broadcast_to((col <= W - 2).astype(f32), (C, HW))   # dx = +1

    def build_patch(get_act):
        # get_act(b) -> (C, HW) f32 activation of batch element b.
        for b in range(B):
            pad_ref[:, PAD:PAD + HW] = get_act(b)
            t = 0
            for dy in (-1, 0, 1):
                for dx in (-1, 0, 1):
                    off = dy * W + dx
                    tap = pad_ref[:, PAD + off:PAD + off + HW]   # lane-offset read
                    if dx == -1:
                        tap = tap * mask_l
                    elif dx == 1:
                        tap = tap * mask_r
                    patch_ref[t * C:(t + 1) * C, b * HW:(b + 1) * HW] = (
                        tap.astype(bf16))
                    t += 1

    def cbn(idx):
        # 3x3 conv + folded BN (bias via the ones row) as ONE MXU matmul,
        # bf16 operands / f32 accumulation, followed by HSwish.
        y = jnp.dot(w_ref[idx], patch_ref[...], preferred_element_type=f32)
        return y * jnp.clip(y + 3.0, 0.0, 6.0) * (1.0 / 6.0)

    build_patch(lambda b: x_ref[b].astype(f32))
    t0 = cbn(0)                                       # inconv   (C -> C)
    build_patch(lambda b: t0[:, b * HW:(b + 1) * HW])
    ud = cbn(1)                                       # merged up (rows :half) / down (rows half:)
    build_patch(lambda b: ud[:, b * HW:(b + 1) * HW])
    dn2 = cbn(2)                                      # downconv2 (real rows half:)

    # torch.cat([up, down2], dim=1): take up rows from ud, down2 rows from dn2.
    sel = jax.lax.broadcasted_iota(jnp.int32, (C, 1), 0) < half
    out = jnp.where(sel, ud, dn2)                     # (C, B*HW)
    for b in range(B):
        o_ref[b] = out[:, b * HW:(b + 1) * HW].astype(o_ref.dtype)


def _fold_cbn(w, gamma, beta, mean, var, cin_total, cin_off, cout_total,
              cout_off):
    """Fold inference BN into the conv weight/bias and embed them into the
    padded (cout_total, 9*cin_total + 1) layout; the last column is the bias
    (matched by a constant ones row appended to the im2col patch)."""
    cout, cin = w.shape[0], w.shape[1]
    scale = (gamma / jnp.sqrt(var + _BN_EPS)).astype(jnp.float32)     # (cout,)
    wf = w.astype(jnp.float32) * scale[:, None, None, None]           # OIHW
    wf = jnp.transpose(wf, (0, 2, 3, 1)).reshape(cout, 9, cin)        # (o, tap, i)
    wp = jnp.zeros((cout_total, 9, cin_total), jnp.float32)
    wp = wp.at[cout_off:cout_off + cout, :, cin_off:cin_off + cin].set(wf)
    wp = wp.reshape(cout_total, 9 * cin_total)
    bias = (beta - mean * scale).astype(jnp.float32)
    bp = jnp.zeros((cout_total, 1), jnp.float32)
    bp = bp.at[cout_off:cout_off + cout, 0].set(bias)
    return jnp.concatenate([wp, bp], axis=1)          # (cout_total, 9*cin_total+1)


def context_module(x_nchw, params, *, batch_block=None):
    """ContextModule forward.  x_nchw: (N, C, H, W) -> (N, C, H, W)."""
    N, C, H, W = x_nchw.shape
    half = C // 2
    HW = H * W
    K = 9 * C + 1
    pad = ((W + 1 + 127) // 128) * 128   # lane-aligned halo, >= W + 1

    if batch_block is None:
        # Amortize per-step overhead (serial grid on v5e/v6e) while keeping at
        # least 2 grid steps so both v7x TensorCores are used when N >= 2.
        batch_block = max(1, min(8, N // 2))
        while N % batch_block:
            batch_block -= 1
    BB = batch_block

    # Fold BN into weights; fold channel chunk/concat into padded layouts.
    w_in = _fold_cbn(*params["inconv"], C, 0, C, 0)
    # Merged up/down conv: up -> cout [0:half] from cin [0:half],
    #                      down -> cout [half:C] from cin [half:C].
    w_ud = (_fold_cbn(*params["upconv"], C, 0, C, 0) +
            _fold_cbn(*params["downconv"], C, half, C, half))
    w_dn2 = _fold_cbn(*params["downconv2"], C, half, C, half)
    w_all = jnp.stack([w_in, w_ud, w_dn2]).astype(jnp.bfloat16)   # (3, C, K)

    x = x_nchw.reshape(N, C, HW)                      # NCHW, spatial flattened

    kernel = functools.partial(_context_kernel, H=H, W=W, C=C, B=BB, PAD=pad)
    out = pl.pallas_call(
        kernel,
        out_shape=jax.ShapeDtypeStruct((N, C, HW), x_nchw.dtype),
        grid=(N // BB,),
        in_specs=[
            pl.BlockSpec((BB, C, HW), lambda n: (n, 0, 0)),
            pl.BlockSpec((3, C, K), lambda n: (0, 0, 0)),
        ],
        out_specs=pl.BlockSpec((BB, C, HW), lambda n: (n, 0, 0)),
        scratch_shapes=[
            pltpu.VMEM((C, HW + 2 * pad), jnp.float32),   # padded line buffer
            pltpu.VMEM((K, BB * HW), jnp.bfloat16),       # im2col patch (+ones row)
        ],
        compiler_params=pltpu.CompilerParams(
            dimension_semantics=("parallel",)),
    )(x, w_all)
    return out.reshape(N, C, H, W)


# ----------------------------- reference & test -----------------------------

def _init_cbn_params(key, cin, cout):
    kw, kg, kb, km, kv = jax.random.split(key, 5)
    w = jax.random.normal(kw, (cout, cin, 3, 3), jnp.float32) * 0.1   # OIHW
    gamma = 1.0 + 0.1 * jax.random.normal(kg, (cout,), jnp.float32)
    beta = 0.1 * jax.random.normal(kb, (cout,), jnp.float32)
    mean = 0.1 * jax.random.normal(km, (cout,), jnp.float32)
    var = jnp.abs(jax.random.normal(kv, (cout,), jnp.float32)) + 0.5
    return (w, gamma, beta, mean, var)


def _cbn_reference(x_nchw, w, gamma, beta, mean, var):
    y = jax.lax.conv_general_dilated(
        x_nchw, w, window_strides=(1, 1), padding="SAME",
        dimension_numbers=("NCHW", "OIHW", "NCHW"))
    scale = gamma / jnp.sqrt(var + _BN_EPS)
    shift = beta - mean * scale
    y = y * scale[None, :, None, None] + shift[None, :, None, None]
    return y * jnp.clip(y + 3.0, 0.0, 6.0) / 6.0


def _context_reference(x_nchw, params):
    x = _cbn_reference(x_nchw, *params["inconv"])
    half = x.shape[1] // 2
    up, down = x[:, :half], x[:, half:]
    up = _cbn_reference(up, *params["upconv"])
    down = _cbn_reference(down, *params["downconv"])
    down = _cbn_reference(down, *params["downconv2"])
    return jnp.concatenate([up, down], axis=1)


if __name__ == "__main__":
    N, C, H, W = 4, 8, 16, 16        # inchannel=8 -> half=4; exercises BB=2
    half = C // 2

    root = jax.random.PRNGKey(0)
    kx, k0, k1, k2, k3 = jax.random.split(root, 5)

    x = jax.random.normal(kx, (N, C, H, W), jnp.float32)
    params = {
        "inconv": _init_cbn_params(k0, C, C),
        "upconv": _init_cbn_params(k1, half, half),
        "downconv": _init_cbn_params(k2, half, half),
        "downconv2": _init_cbn_params(k3, half, half),
    }

    out = jax.jit(context_module)(x, params)
    out = jax.block_until_ready(out)

    ref = _context_reference(x, params)
    assert out.shape == (N, C, H, W)
    # Tolerance loosened for the bf16 patch/weights (f32 MXU accumulation).
    assert jnp.allclose(out, ref, atol=5e-2, rtol=5e-2), (
        float(jnp.max(jnp.abs(out - ref))))

    print("KERNEL_OK")
</pallas_src>

<mosaic_0001>
module attributes {stable_mosaic.version = 11 : i64} {
  func.func @_context_kernel(%arg0: i32, %arg1: memref<2x8x256xf32, #tpu.memory_space<vmem>>, %arg2: memref<3x8x73xbf16, #tpu.memory_space<vmem>>, %arg3: memref<2x8x256xf32, #tpu.memory_space<vmem>>, %arg4: memref<8x512xf32, #tpu.memory_space<vmem>>, %arg5: memref<73x512xbf16, #tpu.memory_space<vmem>>) attributes {dimension_semantics = [#tpu.dimension_semantics<parallel>], iteration_bounds = array<i64: 2>, scalar_prefetch = 0 : i64, scratch_operands = 2 : i64, tpu.core_type = #tpu.core_type<tc>, window_params = [{transform_indices = @transform_0, window_bounds = array<i64: 2, 8, 256>}, {pipeline_mode = #tpu.pipeline_mode<synchronous>, transform_indices = @transform_1, window_bounds = array<i64: 3, 8, 73>}, {transform_indices = @transform_2, window_bounds = array<i64: 2, 8, 256>}]} {
    %cst = arith.constant 0.000000e+00 : f32
    %0 = vector.broadcast %cst : f32 to vector<8x128xf32>
    %c0 = arith.constant 0 : index
    %c0_0 = arith.constant 0 : index
    %1 = vector.load %arg4[%c0, %c0_0] : memref<8x512xf32, #tpu.memory_space<vmem>>, vector<8x128xf32>
    tpu.vector_store %arg4[%c0, %c0_0], %0 {strides = array<i32>} : memref<8x512xf32, #tpu.memory_space<vmem>>, vector<8x128xf32>,
    %cst_1 = arith.constant 0.000000e+00 : f32
    %2 = vector.broadcast %cst_1 : f32 to vector<8x128xf32>
    %c0_2 = arith.constant 0 : index
    %c384 = arith.constant 384 : index
    %3 = vector.load %arg4[%c0_2, %c384] : memref<8x512xf32, #tpu.memory_space<vmem>>, vector<8x128xf32>
    tpu.vector_store %arg4[%c0_2, %c384], %2 {strides = array<i32>} : memref<8x512xf32, #tpu.memory_space<vmem>>, vector<8x128xf32>,
    %cst_3 = arith.constant 1.000000e+00 : bf16
    %4 = vector.broadcast %cst_3 : bf16 to vector<1x512xbf16>
    %c72 = arith.constant 72 : index
    %c0_4 = arith.constant 0 : index
    %5 = vector.load %arg5[%c72, %c0_4] : memref<73x512xbf16, #tpu.memory_space<vmem>>, vector<1x512xbf16>
    tpu.vector_store %arg5[%c72, %c0_4], %4 {strides = array<i32>} : memref<73x512xbf16, #tpu.memory_space<vmem>>, vector<1x512xbf16>,
    %6 = tpu.iota {dimensions = array<i32: 1>} : vector<1x256xi32>
    %c16_i32 = arith.constant 16 : i32
    %c0_i32 = arith.constant 0 : i32
    %7 = arith.cmpi eq, %c16_i32, %c0_i32 : i32
    %c1_i32 = arith.constant 1 : i32
    %8 = arith.select %7, %c1_i32, %c16_i32 : i32
    %9 = vector.broadcast %8 : i32 to vector<1x256xi32>
    %10 = arith.remsi %6, %9 : vector<1x256xi32>
    %c0_i32_5 = arith.constant 0 : i32
    %11 = vector.broadcast %c0_i32_5 : i32 to vector<1x256xi32>
    %12 = arith.cmpi ne, %10, %11 : vector<1x256xi32>
    %c0_i32_6 = arith.constant 0 : i32
    %13 = vector.broadcast %c0_i32_6 : i32 to vector<1x256xi32>
    %14 = arith.cmpi slt, %10, %13 : vector<1x256xi32>
    %c0_i32_7 = arith.constant 0 : i32
    %15 = arith.cmpi slt, %8, %c0_i32_7 : i32
    %16 = vector.broadcast %15 : i1 to vector<1x256xi1>
    %17 = vector.broadcast %16 : vector<1x256xi1> to vector<1x256xi1>
    %18 = arith.xori %14, %17 : vector<1x256xi1>
    %19 = arith.andi %18, %12 : vector<1x256xi1>
    %20 = vector.broadcast %8 : i32 to vector<1x256xi32>
    %21 = arith.addi %10, %20 : vector<1x256xi32>
    %22 = arith.select %19, %21, %10 : vector<1x256xi1>, vector<1x256xi32>
    %c1_i32_8 = arith.constant 1 : i32
    %23 = vector.broadcast %c1_i32_8 : i32 to vector<1x256xi32>
    %24 = arith.cmpi sge, %22, %23 : vector<1x256xi32>
    %25 = arith.extui %24 : vector<1x256xi1> to vector<1x256xi32>
    %26 = arith.sitofp %25 : vector<1x256xi32> to vector<1x256xf32>
    %27 = vector.shape_cast %26 : vector<1x256xf32> to vector<1x256xf32>
    %28 = vector.broadcast %27 : vector<1x256xf32> to vector<8x256xf32>
    %c14_i32 = arith.constant 14 : i32
    %29 = vector.broadcast %c14_i32 : i32 to vector<1x256xi32>
    %30 = arith.cmpi sle, %22, %29 : vector<1x256xi32>
    %31 = arith.extui %30 : vector<1x256xi1> to vector<1x256xi32>
    %32 = arith.sitofp %31 : vector<1x256xi32> to vector<1x256xf32>
    %33 = vector.shape_cast %32 : vector<1x256xf32> to vector<1x256xf32>
    %34 = vector.broadcast %33 : vector<1x256xf32> to vector<8x256xf32>
    %c0_9 = arith.constant 0 : index
    %c0_10 = arith.constant 0 : index
    %c0_11 = arith.constant 0 : index
    %35 = vector.load %arg1[%c0_9, %c0_10, %c0_11] : memref<2x8x256xf32, #tpu.memory_space<vmem>>, vector<1x8x256xf32>
    %36 = vector.shape_cast %35 : vector<1x8x256xf32> to vector<8x256xf32>
    %c0_12 = arith.constant 0 : index
    %c128 = arith.constant 128 : index
    %37 = vector.load %arg4[%c0_12, %c128] : memref<8x512xf32, #tpu.memory_space<vmem>>, vector<8x256xf32>
    tpu.vector_store %arg4[%c0_12, %c128], %36 {strides = array<i32>} : memref<8x512xf32, #tpu.memory_space<vmem>>, vector<8x256xf32>,
    %c0_13 = arith.constant 0 : index
    %c111 = arith.constant 111 : index
    %38 = vector.load %arg4[%c0_13, %c111] : memref<8x512xf32, #tpu.memory_space<vmem>>, vector<8x256xf32>
    %39 = arith.mulf %38, %28 : vector<8x256xf32>
    %40 = arith.truncf %39 : vector<8x256xf32> to vector<8x256xbf16>
    %c0_14 = arith.constant 0 : index
    %c0_15 = arith.constant 0 : index
    %41 = vector.load %arg5[%c0_14, %c0_15] : memref<73x512xbf16, #tpu.memory_space<vmem>>, vector<8x256xbf16>
    tpu.vector_store %arg5[%c0_14, %c0_15], %40 {strides = array<i32>} : memref<73x512xbf16, #tpu.memory_space<vmem>>, vector<8x256xbf16>,
    %c0_16 = arith.constant 0 : index
    %c112 = arith.constant 112 : index
    %42 = vector.load %arg4[%c0_16, %c112] : memref<8x512xf32, #tpu.memory_space<vmem>>, vector<8x256xf32>
    %43 = arith.truncf %42 : vector<8x256xf32> to vector<8x256xbf16>
    %c8 = arith.constant 8 : index
    %c0_17 = arith.constant 0 : index
    %44 = vector.load %arg5[%c8, %c0_17] : memref<73x512xbf16, #tpu.memory_space<vmem>>, vector<8x256xbf16>
    tpu.vector_store %arg5[%c8, %c0_17], %43 {strides = array<i32>} : memref<73x512xbf16, #tpu.memory_space<vmem>>, vector<8x256xbf16>,
    %c0_18 = arith.constant 0 : index
    %c113 = arith.constant 113 : index
    %45 = vector.load %arg4[%c0_18, %c113] : memref<8x512xf32, #tpu.memory_space<vmem>>, vector<8x256xf32>
    %46 = arith.mulf %45, %34 : vector<8x256xf32>
    %47 = arith.truncf %46 : vector<8x256xf32> to vector<8x256xbf16>
    %c16 = arith.constant 16 : index
    %c0_19 = arith.constant 0 : index
    %48 = vector.load %arg5[%c16, %c0_19] : memref<73x512xbf16, #tpu.memory_space<vmem>>, vector<8x256xbf16>
    tpu.vector_store %arg5[%c16, %c0_19], %47 {strides = array<i32>} : memref<73x512xbf16, #tpu.memory_space<vmem>>, vector<8x256xbf16>,
    %c0_20 = arith.constant 0 : index
    %c127 = arith.constant 127 : index
    %49 = vector.load %arg4[%c0_20, %c127] : memref<8x512xf32, #tpu.memory_space<vmem>>, vector<8x256xf32>
    %50 = arith.mulf %49, %28 : vector<8x256xf32>
    %51 = arith.truncf %50 : vector<8x256xf32> to vector<8x256xbf16>
    %c24 = arith.constant 24 : index
    %c0_21 = arith.constant 0 : index
    %52 = vector.load %arg5[%c24, %c0_21] : memref<73x512xbf16, #tpu.memory_space<vmem>>, vector<8x256xbf16>
    tpu.vector_store %arg5[%c24, %c0_21], %51 {strides = array<i32>} : memref<73x512xbf16, #tpu.memory_space<vmem>>, vector<8x256xbf16>,
    %c0_22 = arith.constant 0 : index
    %c128_23 = arith.constant 128 : index
    %53 = vector.load %arg4[%c0_22, %c128_23] : memref<8x512xf32, #tpu.memory_space<vmem>>, vector<8x256xf32>
    %54 = arith.truncf %53 : vector<8x256xf32> to vector<8x256xbf16>
    %c32 = arith.constant 32 : index
    %c0_24 = arith.constant 0 : index
    %55 = vector.load %arg5[%c32, %c0_24] : memref<73x512xbf16, #tpu.memory_space<vmem>>, vector<8x256xbf16>
    tpu.vector_store %arg5[%c32, %c0_24], %54 {strides = array<i32>} : memref<73x512xbf16, #tpu.memory_space<vmem>>, vector<8x256xbf16>,
    %c0_25 = arith.constant 0 : index
    %c129 = arith.constant 129 : index
    %56 = vector.load %arg4[%c0_25, %c129] : memref<8x512xf32, #tpu.memory_space<vmem>>, vector<8x256xf32>
    %57 = arith.mulf %56, %34 : vector<8x256xf32>
    %58 = arith.truncf %57 : vector<8x256xf32> to vector<8x256xbf16>
    %c40 = arith.constant 40 : index
    %c0_26 = arith.constant 0 : index
    %59 = vector.load %arg5[%c40, %c0_26] : memref<73x512xbf16, #tpu.memory_space<vmem>>, vector<8x256xbf16>
    tpu.vector_store %arg5[%c40, %c0_26], %58 {strides = array<i32>} : memref<73x512xbf16, #tpu.memory_space<vmem>>, vector<8x256xbf16>,
    %c0_27 = arith.constant 0 : index
    %c143 = arith.constant 143 : index
    %60 = vector.load %arg4[%c0_27, %c143] : memref<8x512xf32, #tpu.memory_space<vmem>>, vector<8x256xf32>
    %61 = arith.mulf %60, %28 : vector<8x256xf32>
    %62 = arith.truncf %61 : vector<8x256xf32> to vector<8x256xbf16>
    %c48 = arith.constant 48 : index
    %c0_28 = arith.constant 0 : index
    %63 = vector.load %arg5[%c48, %c0_28] : memref<73x512xbf16, #tpu.memory_space<vmem>>, vector<8x256xbf16>
    tpu.vector_store %arg5[%c48, %c0_28], %62 {strides = array<i32>} : memref<73x512xbf16, #tpu.memory_space<vmem>>, vector<8x256xbf16>,
    %c0_29 = arith.constant 0 : index
    %c144 = arith.constant 144 : index
    %64 = vector.load %arg4[%c0_29, %c144] : memref<8x512xf32, #tpu.memory_space<vmem>>, vector<8x256xf32>
    %65 = arith.truncf %64 : vector<8x256xf32> to vector<8x256xbf16>
    %c56 = arith.constant 56 : index
    %c0_30 = arith.constant 0 : index
    %66 = vector.load %arg5[%c56, %c0_30] : memref<73x512xbf16, #tpu.memory_space<vmem>>, vector<8x256xbf16>
    tpu.vector_store %arg5[%c56, %c0_30], %65 {strides = array<i32>} : memref<73x512xbf16, #tpu.memory_space<vmem>>, vector<8x256xbf16>,
    %c0_31 = arith.constant 0 : index
    %c145 = arith.constant 145 : index
    %67 = vector.load %arg4[%c0_31, %c145] : memref<8x512xf32, #tpu.memory_space<vmem>>, vector<8x256xf32>
    %68 = arith.mulf %67, %34 : vector<8x256xf32>
    %69 = arith.truncf %68 : vector<8x256xf32> to vector<8x256xbf16>
    %c64 = arith.constant 64 : index
    %c0_32 = arith.constant 0 : index
    %70 = vector.load %arg5[%c64, %c0_32] : memref<73x512xbf16, #tpu.memory_space<vmem>>, vector<8x256xbf16>
    tpu.vector_store %arg5[%c64, %c0_32], %69 {strides = array<i32>} : memref<73x512xbf16, #tpu.memory_space<vmem>>, vector<8x256xbf16>,
    %c1 = arith.constant 1 : index
    %c0_33 = arith.constant 0 : index
    %c0_34 = arith.constant 0 : index
    %71 = vector.load %arg1[%c1, %c0_33, %c0_34] : memref<2x8x256xf32, #tpu.memory_space<vmem>>, vector<1x8x256xf32>
    %72 = vector.shape_cast %71 : vector<1x8x256xf32> to vector<8x256xf32>
    %c0_35 = arith.constant 0 : index
    %c128_36 = arith.constant 128 : index
    %73 = vector.load %arg4[%c0_35, %c128_36] : memref<8x512xf32, #tpu.memory_space<vmem>>, vector<8x256xf32>
    tpu.vector_store %arg4[%c0_35, %c128_36], %72 {strides = array<i32>} : memref<8x512xf32, #tpu.memory_space<vmem>>, vector<8x256xf32>,
    %c0_37 = arith.constant 0 : index
    %c111_38 = arith.constant 111 : index
    %74 = vector.load %arg4[%c0_37, %c111_38] : memref<8x512xf32, #tpu.memory_space<vmem>>, vector<8x256xf32>
    %75 = arith.mulf %74, %28 : vector<8x256xf32>
    %76 = arith.truncf %75 : vector<8x256xf32> to vector<8x256xbf16>
    %c0_39 = arith.constant 0 : index
    %c256 = arith.constant 256 : index
    %77 = vector.load %arg5[%c0_39, %c256] : memref<73x512xbf16, #tpu.memory_space<vmem>>, vector<8x256xbf16>
    tpu.vector_store %arg5[%c0_39, %c256], %76 {strides = array<i32>} : memref<73x512xbf16, #tpu.memory_space<vmem>>, vector<8x256xbf16>,
    %c0_40 = arith.constant 0 : index
    %c112_41 = arith.constant 112 : index
    %78 = vector.load %arg4[%c0_40, %c112_41] : memref<8x512xf32, #tpu.memory_space<vmem>>, vector<8x256xf32>
    %79 = arith.truncf %78 : vector<8x256xf32> to vector<8x256xbf16>
    %c8_42 = arith.constant 8 : index
    %c256_43 = arith.constant 256 : index
    %80 = vector.load %arg5[%c8_42, %c256_43] : memref<73x512xbf16, #tpu.memory_space<vmem>>, vector<8x256xbf16>
    tpu.vector_store %arg5[%c8_42, %c256_43], %79 {strides = array<i32>} : memref<73x512xbf16, #tpu.memory_space<vmem>>, vector<8x256xbf16>,
    %c0_44 = arith.constant 0 : index
    %c113_45 = arith.constant 113 : index
    %81 = vector.load %arg4[%c0_44, %c113_45] : memref<8x512xf32, #tpu.memory_space<vmem>>, vector<8x256xf32>
    %82 = arith.mulf %81, %34 : vector<8x256xf32>
    %83 = arith.truncf %82 : vector<8x256xf32> to vector<8x256xbf16>
    %c16_46 = arith.constant 16 : index
    %c256_47 = arith.constant 256 : index
    %84 = vector.load %arg5[%c16_46, %c256_47] : memref<73x512xbf16, #tpu.memory_space<vmem>>, vector<8x256xbf16>
    tpu.vector_store %arg5[%c16_46, %c256_47], %83 {strides = array<i32>} : memref<73x512xbf16, #tpu.memory_space<vmem>>, vector<8x256xbf16>,
    %c0_48 = arith.constant 0 : index
    %c127_49 = arith.constant 127 : index
    %85 = vector.load %arg4[%c0_48, %c127_49] : memref<8x512xf32, #tpu.memory_space<vmem>>, vector<8x256xf32>
    %86 = arith.mulf %85, %28 : vector<8x256xf32>
    %87 = arith.truncf %86 : vector<8x256xf32> to vector<8x256xbf16>
    %c24_50 = arith.constant 24 : index
    %c256_51 = arith.constant 256 : index
    %88 = vector.load %arg5[%c24_50, %c256_51] : memref<73x512xbf16, #tpu.memory_space<vmem>>, vector<8x256xbf16>
    tpu.vector_store %arg5[%c24_50, %c256_51], %87 {strides = array<i32>} : memref<73x512xbf16, #tpu.memory_space<vmem>>, vector<8x256xbf16>,
    %c0_52 = arith.constant 0 : index
    %c128_53 = arith.constant 128 : index
    %89 = vector.load %arg4[%c0_52, %c128_53] : memref<8x512xf32, #tpu.memory_space<vmem>>, vector<8x256xf32>
    %90 = arith.truncf %89 : vector<8x256xf32> to vector<8x256xbf16>
    %c32_54 = arith.constant 32 : index
    %c256_55 = arith.constant 256 : index
    %91 = vector.load %arg5[%c32_54, %c256_55] : memref<73x512xbf16, #tpu.memory_space<vmem>>, vector<8x256xbf16>
    tpu.vector_store %arg5[%c32_54, %c256_55], %90 {strides = array<i32>} : memref<73x512xbf16, #tpu.memory_space<vmem>>, vector<8x256xbf16>,
    %c0_56 = arith.constant 0 : index
    %c129_57 = arith.constant 129 : index
    %92 = vector.load %arg4[%c0_56, %c129_57] : memref<8x512xf32, #tpu.memory_space<vmem>>, vector<8x256xf32>
    %93 = arith.mulf %92, %34 : vector<8x256xf32>
    %94 = arith.truncf %93 : vector<8x256xf32> to vector<8x256xbf16>
    %c40_58 = arith.constant 40 : index
    %c256_59 = arith.constant 256 : index
    %95 = vector.load %arg5[%c40_58, %c256_59] : memref<73x512xbf16, #tpu.memory_space<vmem>>, vector<8x256xbf16>
    tpu.vector_store %arg5[%c40_58, %c256_59], %94 {strides = array<i32>} : memref<73x512xbf16, #tpu.memory_space<vmem>>, vector<8x256xbf16>,
    %c0_60 = arith.constant 0 : index
    %c143_61 = arith.constant 143 : index
    %96 = vector.load %arg4[%c0_60, %c143_61] : memref<8x512xf32, #tpu.memory_space<vmem>>, vector<8x256xf32>
    %97 = arith.mulf %96, %28 : vector<8x256xf32>
    %98 = arith.truncf %97 : vector<8x256xf32> to vector<8x256xbf16>
    %c48_62 = arith.constant 48 : index
    %c256_63 = arith.constant 256 : index
    %99 = vector.load %arg5[%c48_62, %c256_63] : memref<73x512xbf16, #tpu.memory_space<vmem>>, vector<8x256xbf16>
    tpu.vector_store %arg5[%c48_62, %c256_63], %98 {strides = array<i32>} : memref<73x512xbf16, #tpu.memory_space<vmem>>, vector<8x256xbf16>,
    %c0_64 = arith.constant 0 : index
    %c144_65 = arith.constant 144 : index
    %100 = vector.load %arg4[%c0_64, %c144_65] : memref<8x512xf32, #tpu.memory_space<vmem>>, vector<8x256xf32>
    %101 = arith.truncf %100 : vector<8x256xf32> to vector<8x256xbf16>
    %c56_66 = arith.constant 56 : index
    %c256_67 = arith.constant 256 : index
    %102 = vector.load %arg5[%c56_66, %c256_67] : memref<73x512xbf16, #tpu.memory_space<vmem>>, vector<8x256xbf16>
    tpu.vector_store %arg5[%c56_66, %c256_67], %101 {strides = array<i32>} : memref<73x512xbf16, #tpu.memory_space<vmem>>, vector<8x256xbf16>,
    %c0_68 = arith.constant 0 : index
    %c145_69 = arith.constant 145 : index
    %103 = vector.load %arg4[%c0_68, %c145_69] : memref<8x512xf32, #tpu.memory_space<vmem>>, vector<8x256xf32>
    %104 = arith.mulf %103, %34 : vector<8x256xf32>
    %105 = arith.truncf %104 : vector<8x256xf32> to vector<8x256xbf16>
    %c64_70 = arith.constant 64 : index
    %c256_71 = arith.constant 256 : index
    %106 = vector.load %arg5[%c64_70, %c256_71] : memref<73x512xbf16, #tpu.memory_space<vmem>>, vector<8x256xbf16>
    tpu.vector_store %arg5[%c64_70, %c256_71], %105 {strides = array<i32>} : memref<73x512xbf16, #tpu.memory_space<vmem>>, vector<8x256xbf16>,
    %c0_72 = arith.constant 0 : index
    %c0_73 = arith.constant 0 : index
    %c0_74 = arith.constant 0 : index
    %107 = vector.load %arg2[%c0_72, %c0_73, %c0_74] : memref<3x8x73xbf16, #tpu.memory_space<vmem>>, vector<1x8x73xbf16>
    %108 = vector.shape_cast %107 : vector<1x8x73xbf16> to vector<8x73xbf16>
    %c0_75 = arith.constant 0 : index
    %c0_76 = arith.constant 0 : index
    %109 = vector.load %arg5[%c0_75, %c0_76] : memref<73x512xbf16, #tpu.memory_space<vmem>>, vector<73x512xbf16>
    %cst_77 = arith.constant dense<0.000000e+00> : vector<8x512xf32>
    %110 = tpu.matmul %108, %109, %cst_77 {dimension_numbers = #tpu.dot_dimension_numbers<[1], [0], [0], [1], [0, 0, 1, 1], [], []>} : vector<8x73xbf16>, vector<73x512xbf16>, vector<8x512xf32> -> vector<8x512xf32>
    %cst_78 = arith.constant 3.000000e+00 : f32
    %111 = vector.broadcast %cst_78 : f32 to vector<8x512xf32>
    %112 = arith.addf %110, %111 : vector<8x512xf32>
    %cst_79 = arith.constant 0.000000e+00 : f32
    %cst_80 = arith.constant 6.000000e+00 : f32
    %113 = vector.broadcast %cst_79 : f32 to vector<8x512xf32>
    %114 = arith.maximumf %113, %112 : vector<8x512xf32>
    %115 = vector.broadcast %cst_80 : f32 to vector<8x512xf32>
    %116 = arith.minimumf %115, %114 : vector<8x512xf32>
    %117 = arith.mulf %110, %116 : vector<8x512xf32>
    %cst_81 = arith.constant 0.166666672 : f32
    %118 = vector.broadcast %cst_81 : f32 to vector<8x512xf32>
    %119 = arith.mulf %117, %118 : vector<8x512xf32>
    %120 = vector.extract_strided_slice %119 {offsets = [0, 0], sizes = [8, 256], strides = [1, 1]} : vector<8x512xf32> to vector<8x256xf32>
    %c0_82 = arith.constant 0 : index
    %c128_83 = arith.constant 128 : index
    %121 = vector.load %arg4[%c0_82, %c128_83] : memref<8x512xf32, #tpu.memory_space<vmem>>, vector<8x256xf32>
    tpu.vector_store %arg4[%c0_82, %c128_83], %120 {strides = array<i32>} : memref<8x512xf32, #tpu.memory_space<vmem>>, vector<8x256xf32>,
    %c0_84 = arith.constant 0 : index
    %c111_85 = arith.constant 111 : index
    %122 = vector.load %arg4[%c0_84, %c111_85] : memref<8x512xf32, #tpu.memory_space<vmem>>, vector<8x256xf32>
    %123 = arith.mulf %122, %28 : vector<8x256xf32>
    %124 = arith.truncf %123 : vector<8x256xf32> to vector<8x256xbf16>
    %c0_86 = arith.constant 0 : index
    %c0_87 = arith.constant 0 : index
    %125 = vector.load %arg5[%c0_86, %c0_87] : memref<73x512xbf16, #tpu.memory_space<vmem>>, vector<8x256xbf16>
    tpu.vector_store %arg5[%c0_86, %c0_87], %124 {strides = array<i32>} : memref<73x512xbf16, #tpu.memory_space<vmem>>, vector<8x256xbf16>,
    %c0_88 = arith.constant 0 : index
    %c112_89 = arith.constant 112 : index
    %126 = vector.load %arg4[%c0_88, %c112_89] : memref<8x512xf32, #tpu.memory_space<vmem>>, vector<8x256xf32>
    %127 = arith.truncf %126 : vector<8x256xf32> to vector<8x256xbf16>
    %c8_90 = arith.constant 8 : index
    %c0_91 = arith.constant 0 : index
    %128 = vector.load %arg5[%c8_90, %c0_91] : memref<73x512xbf16, #tpu.memory_space<vmem>>, vector<8x256xbf16>
    tpu.vector_store %arg5[%c8_90, %c0_91], %127 {strides = array<i32>} : memref<73x512xbf16, #tpu.memory_space<vmem>>, vector<8x256xbf16>,
    %c0_92 = arith.constant 0 : index
    %c113_93 = arith.constant 113 : index
    %129 = vector.load %arg4[%c0_92, %c113_93] : memref<8x512xf32, #tpu.memory_space<vmem>>, vector<8x256xf32>
    %130 = arith.mulf %129, %34 : vector<8x256xf32>
    %131 = arith.truncf %130 : vector<8x256xf32> to vector<8x256xbf16>
    %c16_94 = arith.constant 16 : index
    %c0_95 = arith.constant 0 : index
    %132 = vector.load %arg5[%c16_94, %c0_95] : memref<73x512xbf16, #tpu.memory_space<vmem>>, vector<8x256xbf16>
    tpu.vector_store %arg5[%c16_94, %c0_95], %131 {strides = array<i32>} : memref<73x512xbf16, #tpu.memory_space<vmem>>, vector<8x256xbf16>,
    %c0_96 = arith.constant 0 : index
    %c127_97 = arith.constant 127 : index
    %133 = vector.load %arg4[%c0_96, %c127_97] : memref<8x512xf32, #tpu.memory_space<vmem>>, vector<8x256xf32>
    %134 = arith.mulf %133, %28 : vector<8x256xf32>
    %135 = arith.truncf %134 : vector<8x256xf32> to vector<8x256xbf16>
    %c24_98 = arith.constant 24 : index
    %c0_99 = arith.constant 0 : index
    %136 = vector.load %arg5[%c24_98, %c0_99] : memref<73x512xbf16, #tpu.memory_space<vmem>>, vector<8x256xbf16>
    tpu.vector_store %arg5[%c24_98, %c0_99], %135 {strides = array<i32>} : memref<73x512xbf16, #tpu.memory_space<vmem>>, vector<8x256xbf16>,
    %c0_100 = arith.constant 0 : index
    %c128_101 = arith.constant 128 : index
    %137 = vector.load %arg4[%c0_100, %c128_101] : memref<8x512xf32, #tpu.memory_space<vmem>>, vector<8x256xf32>
    %138 = arith.truncf %137 : vector<8x256xf32> to vector<8x256xbf16>
    %c32_102 = arith.constant 32 : index
    %c0_103 = arith.constant 0 : index
    %139 = vector.load %arg5[%c32_102, %c0_103] : memref<73x512xbf16, #tpu.memory_space<vmem>>, vector<8x256xbf16>
    tpu.vector_store %arg5[%c32_102, %c0_103], %138 {strides = array<i32>} : memref<73x512xbf16, #tpu.memory_space<vmem>>, vector<8x256xbf16>,
    %c0_104 = arith.constant 0 : index
    %c129_105 = arith.constant 129 : index
    %140 = vector.load %arg4[%c0_104, %c129_105] : memref<8x512xf32, #tpu.memory_space<vmem>>, vector<8x256xf32>
    %141 = arith.mulf %140, %34 : vector<8x256xf32>
    %142 = arith.truncf %141 : vector<8x256xf32> to vector<8x256xbf16>
    %c40_106 = arith.constant 40 : index
    %c0_107 = arith.constant 0 : index
    %143 = vector.load %arg5[%c40_106, %c0_107] : memref<73x512xbf16, #tpu.memory_space<vmem>>, vector<8x256xbf16>
    tpu.vector_store %arg5[%c40_106, %c0_107], %142 {strides = array<i32>} : memref<73x512xbf16, #tpu.memory_space<vmem>>, vector<8x256xbf16>,
    %c0_108 = arith.constant 0 : index
    %c143_109 = arith.constant 143 : index
    %144 = vector.load %arg4[%c0_108, %c143_109] : memref<8x512xf32, #tpu.memory_space<vmem>>, vector<8x256xf32>
    %145 = arith.mulf %144, %28 : vector<8x256xf32>
    %146 = arith.truncf %145 : vector<8x256xf32> to vector<8x256xbf16>
    %c48_110 = arith.constant 48 : index
    %c0_111 = arith.constant 0 : index
    %147 = vector.load %arg5[%c48_110, %c0_111] : memref<73x512xbf16, #tpu.memory_space<vmem>>, vector<8x256xbf16>
    tpu.vector_store %arg5[%c48_110, %c0_111], %146 {strides = array<i32>} : memref<73x512xbf16, #tpu.memory_space<vmem>>, vector<8x256xbf16>,
    %c0_112 = arith.constant 0 : index
    %c144_113 = arith.constant 144 : index
    %148 = vector.load %arg4[%c0_112, %c144_113] : memref<8x512xf32, #tpu.memory_space<vmem>>, vector<8x256xf32>
    %149 = arith.truncf %148 : vector<8x256xf32> to vector<8x256xbf16>
    %c56_114 = arith.constant 56 : index
    %c0_115 = arith.constant 0 : index
    %150 = vector.load %arg5[%c56_114, %c0_115] : memref<73x512xbf16, #tpu.memory_space<vmem>>, vector<8x256xbf16>
    tpu.vector_store %arg5[%c56_114, %c0_115], %149 {strides = array<i32>} : memref<73x512xbf16, #tpu.memory_space<vmem>>, vector<8x256xbf16>,
    %c0_116 = arith.constant 0 : index
    %c145_117 = arith.constant 145 : index
    %151 = vector.load %arg4[%c0_116, %c145_117] : memref<8x512xf32, #tpu.memory_space<vmem>>, vector<8x256xf32>
    %152 = arith.mulf %151, %34 : vector<8x256xf32>
    %153 = arith.truncf %152 : vector<8x256xf32> to vector<8x256xbf16>
    %c64_118 = arith.constant 64 : index
    %c0_119 = arith.constant 0 : index
    %154 = vector.load %arg5[%c64_118, %c0_119] : memref<73x512xbf16, #tpu.memory_space<vmem>>, vector<8x256xbf16>
    tpu.vector_store %arg5[%c64_118, %c0_119], %153 {strides = array<i32>} : memref<73x512xbf16, #tpu.memory_space<vmem>>, vector<8x256xbf16>,
    %155 = vector.extract_strided_slice %119 {offsets = [0, 256], sizes = [8, 256], strides = [1, 1]} : vector<8x512xf32> to vector<8x256xf32>
    %c0_120 = arith.constant 0 : index
    %c128_121 = arith.constant 128 : index
    %156 = vector.load %arg4[%c0_120, %c128_121] : memref<8x512xf32, #tpu.memory_space<vmem>>, vector<8x256xf32>
    tpu.vector_store %arg4[%c0_120, %c128_121], %155 {strides = array<i32>} : memref<8x512xf32, #tpu.memory_space<vmem>>, vector<8x256xf32>,
    %c0_122 = arith.constant 0 : index
    %c111_123 = arith.constant 111 : index
    %157 = vector.load %arg4[%c0_122, %c111_123] : memref<8x512xf32, #tpu.memory_space<vmem>>, vector<8x256xf32>
    %158 = arith.mulf %157, %28 : vector<8x256xf32>
    %159 = arith.truncf %158 : vector<8x256xf32> to vector<8x256xbf16>
    %c0_124 = arith.constant 0 : index
    %c256_125 = arith.constant 256 : index
    %160 = vector.load %arg5[%c0_124, %c256_125] : memref<73x512xbf16, #tpu.memory_space<vmem>>, vector<8x256xbf16>
    tpu.vector_store %arg5[%c0_124, %c256_125], %159 {strides = array<i32>} : memref<73x512xbf16, #tpu.memory_space<vmem>>, vector<8x256xbf16>,
    %c0_126 = arith.constant 0 : index
    %c112_127 = arith.constant 112 : index
    %161 = vector.load %arg4[%c0_126, %c112_127] : memref<8x512xf32, #tpu.memory_space<vmem>>, vector<8x256xf32>
    %162 = arith.truncf %161 : vector<8x256xf32> to vector<8x256xbf16>
    %c8_128 = arith.constant 8 : index
    %c256_129 = arith.constant 256 : index
    %163 = vector.load %arg5[%c8_128, %c256_129] : memref<73x512xbf16, #tpu.memory_space<vmem>>, vector<8x256xbf16>
    tpu.vector_store %arg5[%c8_128, %c256_129], %162 {strides = array<i32>} : memref<73x512xbf16, #tpu.memory_space<vmem>>, vector<8x256xbf16>,
    %c0_130 = arith.constant 0 : index
    %c113_131 = arith.constant 113 : index
    %164 = vector.load %arg4[%c0_130, %c113_131] : memref<8x512xf32, #tpu.memory_space<vmem>>, vector<8x256xf32>
    %165 = arith.mulf %164, %34 : vector<8x256xf32>
    %166 = arith.truncf %165 : vector<8x256xf32> to vector<8x256xbf16>
    %c16_132 = arith.constant 16 : index
    %c256_133 = arith.constant 256 : index
    %167 = vector.load %arg5[%c16_132, %c256_133] : memref<73x512xbf16, #tpu.memory_space<vmem>>, vector<8x256xbf16>
    tpu.vector_store %arg5[%c16_132, %c256_133], %166 {strides = array<i32>} : memref<73x512xbf16, #tpu.memory_space<vmem>>, vector<8x256xbf16>,
    %c0_134 = arith.constant 0 : index
    %c127_135 = arith.constant 127 : index
    %168 = vector.load %arg4[%c0_134, %c127_135] : memref<8x512xf32, #tpu.memory_space<vmem>>, vector<8x256xf32>
    %169 = arith.mulf %168, %28 : vector<8x256xf32>
    %170 = arith.truncf %169 : vector<8x256xf32> to vector<8x256xbf16>
    %c24_136 = arith.constant 24 : index
    %c256_137 = arith.constant 256 : index
    %171 = vector.load %arg5[%c24_136, %c256_137] : memref<73x512xbf16, #tpu.memory_space<vmem>>, vector<8x256xbf16>
    tpu.vector_store %arg5[%c24_136, %c256_137], %170 {strides = array<i32>} : memref<73x512xbf16, #tpu.memory_space<vmem>>, vector<8x256xbf16>,
    %c0_138 = arith.constant 0 : index
    %c128_139 = arith.constant 128 : index
    %172 = vector.load %arg4[%c0_138, %c128_139] : memref<8x512xf32, #tpu.memory_space<vmem>>, vector<8x256xf32>
    %173 = arith.truncf %172 : vector<8x256xf32> to vector<8x256xbf16>
    %c32_140 = arith.constant 32 : index
    %c256_141 = arith.constant 256 : index
    %174 = vector.load %arg5[%c32_140, %c256_141] : memref<73x512xbf16, #tpu.memory_space<vmem>>, vector<8x256xbf16>
    tpu.vector_store %arg5[%c32_140, %c256_141], %173 {strides = array<i32>} : memref<73x512xbf16, #tpu.memory_space<vmem>>, vector<8x256xbf16>,
    %c0_142 = arith.constant 0 : index
    %c129_143 = arith.constant 129 : index
    %175 = vector.load %arg4[%c0_142, %c129_143] : memref<8x512xf32, #tpu.memory_space<vmem>>, vector<8x256xf32>
    %176 = arith.mulf %175, %34 : vector<8x256xf32>
    %177 = arith.truncf %176 : vector<8x256xf32> to vector<8x256xbf16>
    %c40_144 = arith.constant 40 : index
    %c256_145 = arith.constant 256 : index
    %178 = vector.load %arg5[%c40_144, %c256_145] : memref<73x512xbf16, #tpu.memory_space<vmem>>, vector<8x256xbf16>
    tpu.vector_store %arg5[%c40_144, %c256_145], %177 {strides = array<i32>} : memref<73x512xbf16, #tpu.memory_space<vmem>>, vector<8x256xbf16>,
    %c0_146 = arith.constant 0 : index
    %c143_147 = arith.constant 143 : index
    %179 = vector.load %arg4[%c0_146, %c143_147] : memref<8x512xf32, #tpu.memory_space<vmem>>, vector<8x256xf32>
    %180 = arith.mulf %179, %28 : vector<8x256xf32>
    %181 = arith.truncf %180 : vector<8x256xf32> to vector<8x256xbf16>
    %c48_148 = arith.constant 48 : index
    %c256_149 = arith.constant 256 : index
    %182 = vector.load %arg5[%c48_148, %c256_149] : memref<73x512xbf16, #tpu.memory_space<vmem>>, vector<8x256xbf16>
    tpu.vector_store %arg5[%c48_148, %c256_149], %181 {strides = array<i32>} : memref<73x512xbf16, #tpu.memory_space<vmem>>, vector<8x256xbf16>,
    %c0_150 = arith.constant 0 : index
    %c144_151 = arith.constant 144 : index
    %183 = vector.load %arg4[%c0_150, %c144_151] : memref<8x512xf32, #tpu.memory_space<vmem>>, vector<8x256xf32>
    %184 = arith.truncf %183 : vector<8x256xf32> to vector<8x256xbf16>
    %c56_152 = arith.constant 56 : index
    %c256_153 = arith.constant 256 : index
    %185 = vector.load %arg5[%c56_152, %c256_153] : memref<73x512xbf16, #tpu.memory_space<vmem>>, vector<8x256xbf16>
    tpu.vector_store %arg5[%c56_152, %c256_153], %184 {strides = array<i32>} : memref<73x512xbf16, #tpu.memory_space<vmem>>, vector<8x256xbf16>,
    %c0_154 = arith.constant 0 : index
    %c145_155 = arith.constant 145 : index
    %186 = vector.load %arg4[%c0_154, %c145_155] : memref<8x512xf32, #tpu.memory_space<vmem>>, vector<8x256xf32>
    %187 = arith.mulf %186, %34 : vector<8x256xf32>
    %188 = arith.truncf %187 : vector<8x256xf32> to vector<8x256xbf16>
    %c64_156 = arith.constant 64 : index
    %c256_157 = arith.constant 256 : index
    %189 = vector.load %arg5[%c64_156, %c256_157] : memref<73x512xbf16, #tpu.memory_space<vmem>>, vector<8x256xbf16>
    tpu.vector_store %arg5[%c64_156, %c256_157], %188 {strides = array<i32>} : memref<73x512xbf16, #tpu.memory_space<vmem>>, vector<8x256xbf16>,
    %c1_158 = arith.constant 1 : index
    %c0_159 = arith.constant 0 : index
    %c0_160 = arith.constant 0 : index
    %190 = vector.load %arg2[%c1_158, %c0_159, %c0_160] : memref<3x8x73xbf16, #tpu.memory_space<vmem>>, vector<1x8x73xbf16>
    %191 = vector.shape_cast %190 : vector<1x8x73xbf16> to vector<8x73xbf16>
    %c0_161 = arith.constant 0 : index
    %c0_162 = arith.constant 0 : index
    %192 = vector.load %arg5[%c0_161, %c0_162] : memref<73x512xbf16, #tpu.memory_space<vmem>>, vector<73x512xbf16>
    %cst_163 = arith.constant dense<0.000000e+00> : vector<8x512xf32>
    %193 = tpu.matmul %191, %192, %cst_163 {dimension_numbers = #tpu.dot_dimension_numbers<[1], [0], [0], [1], [0, 0, 1, 1], [], []>} : vector<8x73xbf16>, vector<73x512xbf16>, vector<8x512xf32> -> vector<8x512xf32>
    %cst_164 = arith.constant 3.000000e+00 : f32
    %194 = vector.broadcast %cst_164 : f32 to vector<8x512xf32>
    %195 = arith.addf %193, %194 : vector<8x512xf32>
    %cst_165 = arith.constant 0.000000e+00 : f32
    %cst_166 = arith.constant 6.000000e+00 : f32
    %196 = vector.broadcast %cst_165 : f32 to vector<8x512xf32>
    %197 = arith.maximumf %196, %195 : vector<8x512xf32>
    %198 = vector.broadcast %cst_166 : f32 to vector<8x512xf32>
    %199 = arith.minimumf %198, %197 : vector<8x512xf32>
    %200 = arith.mulf %193, %199 : vector<8x512xf32>
    %cst_167 = arith.constant 0.166666672 : f32
    %201 = vector.broadcast %cst_167 : f32 to vector<8x512xf32>
    %202 = arith.mulf %200, %201 : vector<8x512xf32>
    %203 = vector.extract_strided_slice %202 {offsets = [0, 0], sizes = [8, 256], strides = [1, 1]} : vector<8x512xf32> to vector<8x256xf32>
    %c0_168 = arith.constant 0 : index
    %c128_169 = arith.constant 128 : index
    %204 = vector.load %arg4[%c0_168, %c128_169] : memref<8x512xf32, #tpu.memory_space<vmem>>, vector<8x256xf32>
    tpu.vector_store %arg4[%c0_168, %c128_169], %203 {strides = array<i32>} : memref<8x512xf32, #tpu.memory_space<vmem>>, vector<8x256xf32>,
    %c0_170 = arith.constant 0 : index
    %c111_171 = arith.constant 111 : index
    %205 = vector.load %arg4[%c0_170, %c111_171] : memref<8x512xf32, #tpu.memory_space<vmem>>, vector<8x256xf32>
    %206 = arith.mulf %205, %28 : vector<8x256xf32>
    %207 = arith.truncf %206 : vector<8x256xf32> to vector<8x256xbf16>
    %c0_172 = arith.constant 0 : index
    %c0_173 = arith.constant 0 : index
    %208 = vector.load %arg5[%c0_172, %c0_173] : memref<73x512xbf16, #tpu.memory_space<vmem>>, vector<8x256xbf16>
    tpu.vector_store %arg5[%c0_172, %c0_173], %207 {strides = array<i32>} : memref<73x512xbf16, #tpu.memory_space<vmem>>, vector<8x256xbf16>,
    %c0_174 = arith.constant 0 : index
    %c112_175 = arith.constant 112 : index
    %209 = vector.load %arg4[%c0_174, %c112_175] : memref<8x512xf32, #tpu.memory_space<vmem>>, vector<8x256xf32>
    %210 = arith.truncf %209 : vector<8x256xf32> to vector<8x256xbf16>
    %c8_176 = arith.constant 8 : index
    %c0_177 = arith.constant 0 : index
    %211 = vector.load %arg5[%c8_176, %c0_177] : memref<73x512xbf16, #tpu.memory_space<vmem>>, vector<8x256xbf16>
    tpu.vector_store %arg5[%c8_176, %c0_177], %210 {strides = array<i32>} : memref<73x512xbf16, #tpu.memory_space<vmem>>, vector<8x256xbf16>,
    %c0_178 = arith.constant 0 : index
    %c113_179 = arith.constant 113 : index
    %212 = vector.load %arg4[%c0_178, %c113_179] : memref<8x512xf32, #tpu.memory_space<vmem>>, vector<8x256xf32>
    %213 = arith.mulf %212, %34 : vector<8x256xf32>
    %214 = arith.truncf %213 : vector<8x256xf32> to vector<8x256xbf16>
    %c16_180 = arith.constant 16 : index
    %c0_181 = arith.constant 0 : index
    %215 = vector.load %arg5[%c16_180, %c0_181] : memref<73x512xbf16, #tpu.memory_space<vmem>>, vector<8x256xbf16>
    tpu.vector_store %arg5[%c16_180, %c0_181], %214 {strides = array<i32>} : memref<73x512xbf16, #tpu.memory_space<vmem>>, vector<8x256xbf16>,
    %c0_182 = arith.constant 0 : index
    %c127_183 = arith.constant 127 : index
    %216 = vector.load %arg4[%c0_182, %c127_183] : memref<8x512xf32, #tpu.memory_space<vmem>>, vector<8x256xf32>
    %217 = arith.mulf %216, %28 : vector<8x256xf32>
    %218 = arith.truncf %217 : vector<8x256xf32> to vector<8x256xbf16>
    %c24_184 = arith.constant 24 : index
    %c0_185 = arith.constant 0 : index
    %219 = vector.load %arg5[%c24_184, %c0_185] : memref<73x512xbf16, #tpu.memory_space<vmem>>, vector<8x256xbf16>
    tpu.vector_store %arg5[%c24_184, %c0_185], %218 {strides = array<i32>} : memref<73x512xbf16, #tpu.memory_space<vmem>>, vector<8x256xbf16>,
    %c0_186 = arith.constant 0 : index
    %c128_187 = arith.constant 128 : index
    %220 = vector.load %arg4[%c0_186, %c128_187] : memref<8x512xf32, #tpu.memory_space<vmem>>, vector<8x256xf32>
    %221 = arith.truncf %220 : vector<8x256xf32> to vector<8x256xbf16>
    %c32_188 = arith.constant 32 : index
    %c0_189 = arith.constant 0 : index
    %222 = vector.load %arg5[%c32_188, %c0_189] : memref<73x512xbf16, #tpu.memory_space<vmem>>, vector<8x256xbf16>
    tpu.vector_store %arg5[%c32_188, %c0_189], %221 {strides = array<i32>} : memref<73x512xbf16, #tpu.memory_space<vmem>>, vector<8x256xbf16>,
    %c0_190 = arith.constant 0 : index
    %c129_191 = arith.constant 129 : index
    %223 = vector.load %arg4[%c0_190, %c129_191] : memref<8x512xf32, #tpu.memory_space<vmem>>, vector<8x256xf32>
    %224 = arith.mulf %223, %34 : vector<8x256xf32>
    %225 = arith.truncf %224 : vector<8x256xf32> to vector<8x256xbf16>
    %c40_192 = arith.constant 40 : index
    %c0_193 = arith.constant 0 : index
    %226 = vector.load %arg5[%c40_192, %c0_193] : memref<73x512xbf16, #tpu.memory_space<vmem>>, vector<8x256xbf16>
    tpu.vector_store %arg5[%c40_192, %c0_193], %225 {strides = array<i32>} : memref<73x512xbf16, #tpu.memory_space<vmem>>, vector<8x256xbf16>,
    %c0_194 = arith.constant 0 : index
    %c143_195 = arith.constant 143 : index
    %227 = vector.load %arg4[%c0_194, %c143_195] : memref<8x512xf32, #tpu.memory_space<vmem>>, vector<8x256xf32>
    %228 = arith.mulf %227, %28 : vector<8x256xf32>
    %229 = arith.truncf %228 : vector<8x256xf32> to vector<8x256xbf16>
    %c48_196 = arith.constant 48 : index
    %c0_197 = arith.constant 0 : index
    %230 = vector.load %arg5[%c48_196, %c0_197] : memref<73x512xbf16, #tpu.memory_space<vmem>>, vector<8x256xbf16>
    tpu.vector_store %arg5[%c48_196, %c0_197], %229 {strides = array<i32>} : memref<73x512xbf16, #tpu.memory_space<vmem>>, vector<8x256xbf16>,
    %c0_198 = arith.constant 0 : index
    %c144_199 = arith.constant 144 : index
    %231 = vector.load %arg4[%c0_198, %c144_199] : memref<8x512xf32, #tpu.memory_space<vmem>>, vector<8x256xf32>
    %232 = arith.truncf %231 : vector<8x256xf32> to vector<8x256xbf16>
    %c56_200 = arith.constant 56 : index
    %c0_201 = arith.constant 0 : index
    %233 = vector.load %arg5[%c56_200, %c0_201] : memref<73x512xbf16, #tpu.memory_space<vmem>>, vector<8x256xbf16>
    tpu.vector_store %arg5[%c56_200, %c0_201], %232 {strides = array<i32>} : memref<73x512xbf16, #tpu.memory_space<vmem>>, vector<8x256xbf16>,
    %c0_202 = arith.constant 0 : index
    %c145_203 = arith.constant 145 : index
    %234 = vector.load %arg4[%c0_202, %c145_203] : memref<8x512xf32, #tpu.memory_space<vmem>>, vector<8x256xf32>
    %235 = arith.mulf %234, %34 : vector<8x256xf32>
    %236 = arith.truncf %235 : vector<8x256xf32> to vector<8x256xbf16>
    %c64_204 = arith.constant 64 : index
    %c0_205 = arith.constant 0 : index
    %237 = vector.load %arg5[%c64_204, %c0_205] : memref<73x512xbf16, #tpu.memory_space<vmem>>, vector<8x256xbf16>
    tpu.vector_store %arg5[%c64_204, %c0_205], %236 {strides = array<i32>} : memref<73x512xbf16, #tpu.memory_space<vmem>>, vector<8x256xbf16>,
    %238 = vector.extract_strided_slice %202 {offsets = [0, 256], sizes = [8, 256], strides = [1, 1]} : vector<8x512xf32> to vector<8x256xf32>
    %c0_206 = arith.constant 0 : index
    %c128_207 = arith.constant 128 : index
    %239 = vector.load %arg4[%c0_206, %c128_207] : memref<8x512xf32, #tpu.memory_space<vmem>>, vector<8x256xf32>
    tpu.vector_store %arg4[%c0_206, %c128_207], %238 {strides = array<i32>} : memref<8x512xf32, #tpu.memory_space<vmem>>, vector<8x256xf32>,
    %c0_208 = arith.constant 0 : index
    %c111_209 = arith.constant 111 : index
    %240 = vector.load %arg4[%c0_208, %c111_209] : memref<8x512xf32, #tpu.memory_space<vmem>>, vector<8x256xf32>
    %241 = arith.mulf %240, %28 : vector<8x256xf32>
    %242 = arith.truncf %241 : vector<8x256xf32> to vector<8x256xbf16>
    %c0_210 = arith.constant 0 : index
    %c256_211 = arith.constant 256 : index
    %243 = vector.load %arg5[%c0_210, %c256_211] : memref<73x512xbf16, #tpu.memory_space<vmem>>, vector<8x256xbf16>
    tpu.vector_store %arg5[%c0_210, %c256_211], %242 {strides = array<i32>} : memref<73x512xbf16, #tpu.memory_space<vmem>>, vector<8x256xbf16>,
    %c0_212 = arith.constant 0 : index
    %c112_213 = arith.constant 112 : index
    %244 = vector.load %arg4[%c0_212, %c112_213] : memref<8x512xf32, #tpu.memory_space<vmem>>, vector<8x256xf32>
    %245 = arith.truncf %244 : vector<8x256xf32> to vector<8x256xbf16>
    %c8_214 = arith.constant 8 : index
    %c256_215 = arith.constant 256 : index
    %246 = vector.load %arg5[%c8_214, %c256_215] : memref<73x512xbf16, #tpu.memory_space<vmem>>, vector<8x256xbf16>
    tpu.vector_store %arg5[%c8_214, %c256_215], %245 {strides = array<i32>} : memref<73x512xbf16, #tpu.memory_space<vmem>>, vector<8x256xbf16>,
    %c0_216 = arith.constant 0 : index
    %c113_217 = arith.constant 113 : index
    %247 = vector.load %arg4[%c0_216, %c113_217] : memref<8x512xf32, #tpu.memory_space<vmem>>, vector<8x256xf32>
    %248 = arith.mulf %247, %34 : vector<8x256xf32>
    %249 = arith.truncf %248 : vector<8x256xf32> to vector<8x256xbf16>
    %c16_218 = arith.constant 16 : index
    %c256_219 = arith.constant 256 : index
    %250 = vector.load %arg5[%c16_218, %c256_219] : memref<73x512xbf16, #tpu.memory_space<vmem>>, vector<8x256xbf16>
    tpu.vector_store %arg5[%c16_218, %c256_219], %249 {strides = array<i32>} : memref<73x512xbf16, #tpu.memory_space<vmem>>, vector<8x256xbf16>,
    %c0_220 = arith.constant 0 : index
    %c127_221 = arith.constant 127 : index
    %251 = vector.load %arg4[%c0_220, %c127_221] : memref<8x512xf32, #tpu.memory_space<vmem>>, vector<8x256xf32>
    %252 = arith.mulf %251, %28 : vector<8x256xf32>
    %253 = arith.truncf %252 : vector<8x256xf32> to vector<8x256xbf16>
    %c24_222 = arith.constant 24 : index
    %c256_223 = arith.constant 256 : index
    %254 = vector.load %arg5[%c24_222, %c256_223] : memref<73x512xbf16, #tpu.memory_space<vmem>>, vector<8x256xbf16>
    tpu.vector_store %arg5[%c24_222, %c256_223], %253 {strides = array<i32>} : memref<73x512xbf16, #tpu.memory_space<vmem>>, vector<8x256xbf16>,
    %c0_224 = arith.constant 0 : index
    %c128_225 = arith.constant 128 : index
    %255 = vector.load %arg4[%c0_224, %c128_225] : memref<8x512xf32, #tpu.memory_space<vmem>>, vector<8x256xf32>
    %256 = arith.truncf %255 : vector<8x256xf32> to vector<8x256xbf16>
    %c32_226 = arith.constant 32 : index
    %c256_227 = arith.constant 256 : index
    %257 = vector.load %arg5[%c32_226, %c256_227] : memref<73x512xbf16, #tpu.memory_space<vmem>>, vector<8x256xbf16>
    tpu.vector_store %arg5[%c32_226, %c256_227], %256 {strides = array<i32>} : memref<73x512xbf16, #tpu.memory_space<vmem>>, vector<8x256xbf16>,
    %c0_228 = arith.constant 0 : index
    %c129_229 = arith.constant 129 : index
    %258 = vector.load %arg4[%c0_228, %c129_229] : memref<8x512xf32, #tpu.memory_space<vmem>>, vector<8x256xf32>
    %259 = arith.mulf %258, %34 : vector<8x256xf32>
    %260 = arith.truncf %259 : vector<8x256xf32> to vector<8x256xbf16>
    %c40_230 = arith.constant 40 : index
    %c256_231 = arith.constant 256 : index
    %261 = vector.load %arg5[%c40_230, %c256_231] : memref<73x512xbf16, #tpu.memory_space<vmem>>, vector<8x256xbf16>
    tpu.vector_store %arg5[%c40_230, %c256_231], %260 {strides = array<i32>} : memref<73x512xbf16, #tpu.memory_space<vmem>>, vector<8x256xbf16>,
    %c0_232 = arith.constant 0 : index
    %c143_233 = arith.constant 143 : index
    %262 = vector.load %arg4[%c0_232, %c143_233] : memref<8x512xf32, #tpu.memory_space<vmem>>, vector<8x256xf32>
    %263 = arith.mulf %262, %28 : vector<8x256xf32>
    %264 = arith.truncf %263 : vector<8x256xf32> to vector<8x256xbf16>
    %c48_234 = arith.constant 48 : index
    %c256_235 = arith.constant 256 : index
    %265 = vector.load %arg5[%c48_234, %c256_235] : memref<73x512xbf16, #tpu.memory_space<vmem>>, vector<8x256xbf16>
    tpu.vector_store %arg5[%c48_234, %c256_235], %264 {strides = array<i32>} : memref<73x512xbf16, #tpu.memory_space<vmem>>, vector<8x256xbf16>,
    %c0_236 = arith.constant 0 : index
    %c144_237 = arith.constant 144 : index
    %266 = vector.load %arg4[%c0_236, %c144_237] : memref<8x512xf32, #tpu.memory_space<vmem>>, vector<8x256xf32>
    %267 = arith.truncf %266 : vector<8x256xf32> to vector<8x256xbf16>
    %c56_238 = arith.constant 56 : index
    %c256_239 = arith.constant 256 : index
    %268 = vector.load %arg5[%c56_238, %c256_239] : memref<73x512xbf16, #tpu.memory_space<vmem>>, vector<8x256xbf16>
    tpu.vector_store %arg5[%c56_238, %c256_239], %267 {strides = array<i32>} : memref<73x512xbf16, #tpu.memory_space<vmem>>, vector<8x256xbf16>,
    %c0_240 = arith.constant 0 : index
    %c145_241 = arith.constant 145 : index
    %269 = vector.load %arg4[%c0_240, %c145_241] : memref<8x512xf32, #tpu.memory_space<vmem>>, vector<8x256xf32>
    %270 = arith.mulf %269, %34 : vector<8x256xf32>
    %271 = arith.truncf %270 : vector<8x256xf32> to vector<8x256xbf16>
    %c64_242 = arith.constant 64 : index
    %c256_243 = arith.constant 256 : index
    %272 = vector.load %arg5[%c64_242, %c256_243] : memref<73x512xbf16, #tpu.memory_space<vmem>>, vector<8x256xbf16>
    tpu.vector_store %arg5[%c64_242, %c256_243], %271 {strides = array<i32>} : memref<73x512xbf16, #tpu.memory_space<vmem>>, vector<8x256xbf16>,
    %c2 = arith.constant 2 : index
    %c0_244 = arith.constant 0 : index
    %c0_245 = arith.constant 0 : index
    %273 = vector.load %arg2[%c2, %c0_244, %c0_245] : memref<3x8x73xbf16, #tpu.memory_space<vmem>>, vector<1x8x73xbf16>
    %274 = vector.shape_cast %273 : vector<1x8x73xbf16> to vector<8x73xbf16>
    %c0_246 = arith.constant 0 : index
    %c0_247 = arith.constant 0 : index
    %275 = vector.load %arg5[%c0_246, %c0_247] : memref<73x512xbf16, #tpu.memory_space<vmem>>, vector<73x512xbf16>
    %cst_248 = arith.constant dense<0.000000e+00> : vector<8x512xf32>
    %276 = tpu.matmul %274, %275, %cst_248 {dimension_numbers = #tpu.dot_dimension_numbers<[1], [0], [0], [1], [0, 0, 1, 1], [], []>} : vector<8x73xbf16>, vector<73x512xbf16>, vector<8x512xf32> -> vector<8x512xf32>
    %cst_249 = arith.constant 3.000000e+00 : f32
    %277 = vector.broadcast %cst_249 : f32 to vector<8x512xf32>
    %278 = arith.addf %276, %277 : vector<8x512xf32>
    %cst_250 = arith.constant 0.000000e+00 : f32
    %cst_251 = arith.constant 6.000000e+00 : f32
    %279 = vector.broadcast %cst_250 : f32 to vector<8x512xf32>
    %280 = arith.maximumf %279, %278 : vector<8x512xf32>
    %281 = vector.broadcast %cst_251 : f32 to vector<8x512xf32>
    %282 = arith.minimumf %281, %280 : vector<8x512xf32>
    %283 = arith.mulf %276, %282 : vector<8x512xf32>
    %cst_252 = arith.constant 0.166666672 : f32
    %284 = vector.broadcast %cst_252 : f32 to vector<8x512xf32>
    %285 = arith.mulf %283, %284 : vector<8x512xf32>
    %286 = tpu.iota {dimensions = array<i32: 0>} : vector<8x1xi32>
    %c4_i32 = arith.constant 4 : i32
    %287 = vector.broadcast %c4_i32 : i32 to vector<8x1xi32>
    %288 = arith.cmpi slt, %286, %287 : vector<8x1xi32>
    %289 = vector.shape_cast %288 : vector<8x1xi1> to vector<8x1xi1>
    %290 = vector.broadcast %289 : vector<8x1xi1> to vector<8x512xi1>
    %291 = arith.select %290, %202, %285 : vector<8x512xi1>, vector<8x512xf32>
    %292 = vector.extract_strided_slice %291 {offsets = [0, 0], sizes = [8, 256], strides = [1, 1]} : vector<8x512xf32> to vector<8x256xf32>
    %c0_253 = arith.constant 0 : index
    %c0_254 = arith.constant 0 : index
    %c0_255 = arith.constant 0 : index
    %293 = vector.load %arg3[%c0_253, %c0_254, %c0_255] : memref<2x8x256xf32, #tpu.memory_space<vmem>>, vector<1x8x256xf32>
    %294 = vector.shape_cast %293 : vector<1x8x256xf32> to vector<8x256xf32>
    %295 = vector.shape_cast %292 : vector<8x256xf32> to vector<1x8x256xf32>
    tpu.vector_store %arg3[%c0_253, %c0_254, %c0_255], %295 {strides = array<i32>} : memref<2x8x256xf32, #tpu.memory_space<vmem>>, vector<1x8x256xf32>,
    %296 = vector.extract_strided_slice %291 {offsets = [0, 256], sizes = [8, 256], strides = [1, 1]} : vector<8x512xf32> to vector<8x256xf32>
    %c1_256 = arith.constant 1 : index
    %c0_257 = arith.constant 0 : index
    %c0_258 = arith.constant 0 : index
    %297 = vector.load %arg3[%c1_256, %c0_257, %c0_258] : memref<2x8x256xf32, #tpu.memory_space<vmem>>, vector<1x8x256xf32>
    %298 = vector.shape_cast %297 : vector<1x8x256xf32> to vector<8x256xf32>
    %299 = vector.shape_cast %296 : vector<8x256xf32> to vector<1x8x256xf32>
    tpu.vector_store %arg3[%c1_256, %c0_257, %c0_258], %299 {strides = array<i32>} : memref<2x8x256xf32, #tpu.memory_space<vmem>>, vector<1x8x256xf32>,
    return
  }
  func.func @transform_0(%arg0: i32) -> (i32, i32, i32) {
    %c0_i32 = arith.constant 0 : i32
    %c0_i32_0 = arith.constant 0 : i32
    %c0_i32_1 = arith.constant 0 : i32
    return %arg0, %c0_i32, %c0_i32_0 : i32, i32, i32
  }
  func.func @transform_1(%arg0: i32) -> (i32, i32, i32) {
    %c0_i32 = arith.constant 0 : i32
    %c0_i32_0 = arith.constant 0 : i32
    %c0_i32_1 = arith.constant 0 : i32
    %c0_i32_2 = arith.constant 0 : i32
    return %c0_i32, %c0_i32_0, %c0_i32_1 : i32, i32, i32
  }
  func.func @transform_2(%arg0: i32) -> (i32, i32, i32) {
    %c0_i32 = arith.constant 0 : i32
    %c0_i32_0 = arith.constant 0 : i32
    %c0_i32_1 = arith.constant 0 : i32
    return %arg0, %c0_i32, %c0_i32_0 : i32, i32, i32
  }
}

</mosaic_0001>

<bundles_post_ra>
// kernel: context_module.1
= control target key start
LH: loop header
LB: loop body
LE: loop exit
PB: predicated region body
PF: predicated region fallthrough
CT: control target
= control target key end

     0   :  { %s2779_s9 = smov 0   ;;  %s3398_s0 = inlined_call_operand.vmem [shape: f32[4,8,256], index: 0, kind: input, shape index: {}]   ;;  %s3399_s1 = inlined_call_operand.vmem [shape: bf16[3,8,73], index: 1, kind: input, shape index: {}]   ;;  %s3400_s2 = inlined_call_operand.vmem [shape: f32[4,8,256], index: 2, kind: output, shape index: {}]  }
   0x1 LB: > { %s2399_s10 = sadd.s32 4294967295, %s2750_s9   ;;  %p2403_p0 = scmp.ge.s32.totalorder %s2750_s9, 1  ;;  %s2750_s9 = sphi %s2779_s9, %s12_s9  }
   0x2   : > { %p114_p1 = scmp.lt.s32.totalorder %s2750_s9, 3 }
   0x4   : > { %p115_p2 = pnand %p2403_p0, %p114_p1 }
   0x5   : > { %v169_v0 = vlaneseq (!%p115_p2)  ;;  %s2404_s11 = sshll.u32 (!%p115_p2), %s2399_s10, 1  ;;  %v2752_v5 = vmov (!%p115_p2), 0.0   ;;  %s2753_s13 = smov (!%p115_p2), 111   ;;  %v2760_v21 = vmov (!%p115_p2), 0.0|0.0   ;;  %vm221_vm4 = vcmask (!%p115_p2), 908288  }
   0x6   : > { %118 = sbr.rel (%p115_p2) target bundleno = 1349 (0x545), region = 28  ;;  %p139_p3 = scmp.lt.s32.totalorder (!%p115_p2), %s2404_s11, 3  ;;  %vm286_vm5 = vcmask (!%p115_p2), 924672   ;;  %vm323_vm6 = vcmask (!%p115_p2), 1039360   ;;  %vm349_vm7 = vcmask (!%p115_p2), 7168   ;;  %vm312_vm8 = vcmask (!%p115_p2), 121856  }
   0x7   : > { %v170_v1 = vand.u32 (!%p115_p2), 127, %v169_v0  ;;  %s2754_s14 = smov (!%p115_p2), 127   ;;  %s2755_s18 = smov (!%p115_p2), 113   ;;  %vm156_vm9 = vcmask (!%p115_p2), 1040384   ;;  %vm157_vm10 = vsmask.f32 (!%p115_p2), 256 }
   0x8   : > { %s2756_s19 = smov (!%p115_p2), 1   ;;  %s2757_s20 = smov (!%p115_p2), 15   ;;  %vm159_vm11 = vcmask (!%p115_p2), 1044484   ;;  %vm2926_vm12 = vmand (!%p115_p2), %vm156_vm9, %vm157_vm10  ;;  %vm160_vm13 = vsmask.f32 (!%p115_p2), 4352  ;;  %vm848_vm9 = vcmask (!%p115_p2), 1044480  }
   0x9   : > { %v171_v2 = vadd.s32 (!%p115_p2), 128, %v170_v1  ;;  %v176_v3 = vand.u32 (!%p115_p2), 15, %v170_v1  ;;  %s2758_s21 = smov (!%p115_p2), 17   ;;  %s2759_s22 = smov (!%p115_p2), 16   ;;  %vm2934_vm14 = vmand (!%p115_p2), %vm159_vm11, %vm160_vm13  ;;  %vm843_vm10 = vcmask (!%p115_p2), 596992  }
   0xa   : > { %s2761_s23 = smov (!%p115_p2), 112   ;;  %vm162_vm15 = vmor (!%p115_p2), %vm2934_vm14, %vm2926_vm12 }
   0xb   : > { %v183_v4 = vand.u32 (!%p115_p2), 15, %v171_v2  ;;  %vm196_vm0 = vcmp.ge.s32.totalorder (!%p115_p2), %v176_v3, 1  ;;  %vm202_vm1 = vcmp.le.s32.totalorder (!%p115_p2), %v176_v3, 14 }
   0xc   : > { %v2410_v6 = vsel (!%p115_p2), %vm196_vm0, 1.0, %v2752_v5  ;;  %v2412_v8 = vsel (!%p115_p2), %vm202_vm1, 1.0, %v2752_v5  ;;  %vm248_vm0 = vcmask (!%p115_p2), 138240   ;;  %vm246_vm1 = vcmask (!%p115_p2), 1043456  }
   0xd   : > { %s3406_s11 = smov (!%p139_p3, %s2404_s11), 3  ;;  %vm197_vm2 = vcmp.ge.s32.totalorder %v183_v4, 1  ;;  %vm203_vm3 = vcmp.le.s32.totalorder %v183_v4, 14 }
   0xe   : > { %v2411_v7 = vsel %vm197_vm2, 1.0, %v2752_v5  ;;  %v2413_v9 = vsel %vm203_vm3, 1.0, %v2752_v5  ;;  %s2590_s12 = sshll.u32 %s3406_s11, 4  ;;  %vm273_vm2 = vcmask 130048   ;;  %vm459_vm3 = vcmask 916480  }
   0xf   : > { %v2714_v10 = vpack.i.bf16 %v2411_v7, %v2410_v6  ;;  %v2719_v11 = vpack.i.bf16 %v2413_v9, %v2412_v8  ;;  %s143_s17 = scalar_lea.vmem %s3398_s0, %s2590_s12  ;;  %s150_s4 = scalar_lea.vmem %s3400_s2, %s2590_s12 }
  0x10   : > { %v2804_v12 = vld [vmem:[%s143_s17 + $0x8] sm:$0xff]  ;;  %v2806_v13 = vld [vmem:[%s143_s17] sm:$0xff]  ;;  %v2814_v16 = vld [vmem:[%s143_s17 + $0x18] sm:$0xff] }
  0x11   : > { %2715 = vrot.lane.b32.xlu0 %v2714_v10, %s2753_s13  ;;  %2725 = vrot.lane.b32.xlu1 %v2714_v10, %s2754_s14  ;;  %v2595_v14 = vpack.c.bf16 %v2804_v12, %v2804_v12  ;;  %v2594_v15 = vpack.c.bf16 %v2806_v13, %v2752_v5  ;;  %v2816_v17 = vld [vmem:[%s143_s17 + $0x10] sm:$0xff]  ;;  %v2612_v18 = vpack.c.bf16 %v2814_v16, %v2814_v16 }
  0x12   : > { %v2611_v19 = vpack.c.bf16 %v2816_v17, %v2752_v5  ;;  %v2828_v20 = vpack.c.bf16 %v2804_v12, %v2806_v13  ;;  %v2836_v22 = vpack.c.bf16 %v2814_v16, %v2816_v17 }
  0x15   : > { %2720 = vrot.lane.b32.xlu0 %v2719_v11, %s2755_s18  ;;  %2730 = vrot.lane.b32.xlu1 %v2719_v11, %s2756_s19 }
  0x19   : > { %2735 = vrot.lane.b32.xlu0 %v2714_v10, %s2757_s20  ;;  %2740 = vrot.lane.b32.xlu1 %v2719_v11, %s2758_s21 }
  0x1d   : > { %268 = vrot.lane.b32.xlu1 %v2595_v14, %s2759_s22  ;;  %266 = vrot.lane.b32.xlu0 %v2594_v15, %s2759_s22 }
  0x21   : > { %548 = vrot.lane.b32.xlu1 %v2612_v18, %s2759_s22  ;;  %546 = vrot.lane.b32.xlu0 %v2611_v19, %s2759_s22 }
  0x25   : > { %454 = vrot.lane.b32.xlu1 %v2760_v21, %s2761_s23  ;;  %452 = vrot.lane.b32.xlu0 %v2828_v20, %s2761_s23 }
  0x29   : > { %691 = vrot.lane.b32.xlu1 %v2760_v21, %s2761_s23  ;;  %689 = vrot.lane.b32.xlu0 %v2836_v22, %s2761_s23 }
  0x83   : > { %v2716_v23 = vpop.permute.xlu0 %2715  ;;  %v2726_v26 = vpop.permute.xlu1 %2725 }
  0x84   : > { %v2842_v24 = vunpack.i.h.bf16 %v2716_v23  ;;  %v2717_v25 = vunpack.i.l.bf16 %v2716_v23  ;;  %v2854_v32 = vunpack.i.h.bf16 %v2726_v26  ;;  %v2727_v33 = vunpack.i.l.bf16 %v2726_v26  ;;  %v163_v26 = vld [vmem:[#allocation3 + $0x90] sm:$0x11] }
  0x86   : > { %v2846_v27 = vsel %vm221_vm4, %v2717_v25, %v2842_v24  ;;  %v2848_v28 = vmul.f32 0.0, %v2717_v25  ;;  %v228_v29 = vmul.f32 %v2842_v24, %v2804_v12  ;;  %v510_v37 = vmul.f32 %v2842_v24, %v2814_v16 }
  0x87   : > { %v2721_v30 = vpop.permute.xlu0 %2720  ;;  %v227_v31 = vmul.f32 %v2846_v27, %v2806_v13  ;;  %v509_v39 = vmul.f32 %v2816_v17, %v2846_v27  ;;  %v2877_v44 = vsel %vm323_vm6, %v2727_v33, %v2854_v32  ;;  %v330_v48 = vmul.f32 %v2854_v32, %v2804_v12  ;;  %v2731_v52 = vpop.permute.xlu1 %2730 }
  0x88   : > { %v2856_v34 = vunpack.i.h.bf16 %v2721_v30  ;;  %v2722_v35 = vunpack.i.l.bf16 %v2721_v30  ;;  %v2593_v36 = vpack.c.bf16 %v228_v29, %v228_v29  ;;  %v2610_v45 = vpack.c.bf16 %v510_v37, %v510_v37 }
  0x89   : > { %v2592_v38 = vpack.c.bf16 %v227_v31, %v2848_v28  ;;  %v2609_v46 = vpack.c.bf16 %v509_v39, %v2848_v28  ;;  %v2883_v49 = vmul.f32 0.0, %v2727_v33  ;;  %v329_v51 = vmul.f32 %v2877_v44, %v2806_v13 }
  0x8a   : > { %v2865_v40 = vsel %vm286_vm5, %v2722_v35, %v2856_v34  ;;  %242 = vrot.lane.b32.xlu1 %v2593_v36, %s2758_s21  ;;  %v293_v41 = vmul.f32 %v2856_v34, %v2804_v12  ;;  %v2870_v42 = vmul.f32 0.0, %v2722_v35  ;;  %v2599_v53 = vpack.c.bf16 %v330_v48, %v330_v48 }
  0x8b   : > { %240 = vrot.lane.b32.xlu0 %v2592_v38, %s2758_s21  ;;  %v292_v43 = vmul.f32 %v2865_v40, %v2806_v13  ;;  %v2598_v54 = vpack.c.bf16 %v329_v51, %v2883_v49  ;;  %v2733_v55 = vunpack.i.h.bf16 %v2731_v52  ;;  %v2892_v56 = vunpack.i.l.bf16 %v2731_v52  ;;  %v2736_v1 = vpop.permute.xlu0 %2735  ;;  %v2741_v23 = vpop.permute.xlu1 %2740  ;;  %v166_v38 = vld [vmem:[#allocation3 + $0x98] sm:$0x11] }
  0x8c   : > { %v2597_v47 = vpack.c.bf16 %v293_v41, %v293_v41  ;;  %v561_v57 = vmul.f32 %v2856_v34, %v2814_v16  ;;  %v560_v58 = vmul.f32 %v2816_v17, %v2865_v40  ;;  %v588_v61 = vmul.f32 %v2854_v32, %v2814_v16 }
  0x8d   : > { %v2596_v50 = vpack.c.bf16 %v292_v43, %v2870_v42  ;;  %v2902_v59 = vsel %vm349_vm7, %v2892_v56, %v2733_v55  ;;  %v587_v63 = vmul.f32 %v2816_v17, %v2877_v44  ;;  %v378_v2 = vmul.f32 0.0, %v2733_v55 }
  0x8e   : > { %524 = vrot.lane.b32.xlu1 %v2610_v45, %s2758_s21  ;;  %v2614_v60 = vpack.c.bf16 %v561_v57, %v561_v57  ;;  %v2613_v62 = vpack.c.bf16 %v560_v58, %v2870_v42  ;;  %v376_v3 = vmul.f32 %v2892_v56, %v2806_v13  ;;  %v377_v4 = vmul.f32 %v2902_v59, %v2804_v12 }
  0x8f   : > { %522 = vrot.lane.b32.xlu0 %v2609_v46, %s2758_s21  ;;  %v2616_v6 = vpack.c.bf16 %v588_v61, %v588_v61  ;;  %v2738_v7 = vunpack.i.h.bf16 %v2736_v1  ;;  %v2915_v8 = vunpack.i.l.bf16 %v2736_v1  ;;  %v2615_v9 = vpack.c.bf16 %v587_v63, %v2883_v49 }
  0x90   : > { %v2918_v10 = vpack.c.bf16 %v378_v2, %v378_v2  ;;  %v2601_v11 = vpack.c.bf16 %v377_v4, %v376_v3  ;;  %v624_v18 = vmul.f32 %v2892_v56, %v2816_v17  ;;  %v625_v19 = vmul.f32 %v2814_v16, %v2902_v59 }
  0x91   : > { %v2924_v14 = vsel %vm312_vm8, %v2915_v8, %v2738_v7  ;;  %v415_v29 = vmul.f32 0.0, %v2738_v7  ;;  %v413_v30 = vmul.f32 %v2915_v8, %v2806_v13  ;;  %v164_v33 = vsel %vm162_vm15, 1065369472, %v163_v26 }
  0x92   : > { %307 = vrot.lane.b32.xlu1 %v2597_v47, %s2757_s20  ;;  %v414_v31 = vmul.f32 %v2924_v14, %v2804_v12  ;;  %v2743_v35 = vunpack.i.h.bf16 %v2741_v23  ;;  %v2949_v36 = vunpack.i.l.bf16 %v2741_v23  ;;  %165 = vst [vmem:[#allocation3 + $0x90] sm:$0x11] %v164_v33  ;;  %v2618_v37 = vpack.c.bf16 %v625_v19, %v624_v18 }
  0x93   : > { %305 = vrot.lane.b32.xlu0 %v2596_v50, %s2757_s20  ;;  %v2951_v39 = vpack.c.bf16 %v415_v29, %v415_v29  ;;  %v167_v41 = vsel %vm162_vm15, 1065369472, %v166_v38  ;;  %v651_v46 = vmul.f32 %v2915_v8, %v2816_v17  ;;  %v652_v47 = vmul.f32 %v2814_v16, %v2924_v14 }
  0x94   : > { %v2603_v43 = vpack.c.bf16 %v414_v31, %v413_v30  ;;  %168 = vst [vmem:[#allocation3 + $0x98] sm:$0x11] %v167_v41  ;;  %v2958_v45 = vsel %vm248_vm0, %v2949_v36, %v2743_v35  ;;  %v477_v48 = vmul.f32 0.0, %v2743_v35  ;;  %v475_v50 = vmul.f32 %v2949_v36, %v2806_v13 }
  0x95   : > { %v476_v51 = vmul.f32 %v2958_v45, %v2804_v12  ;;  %v2620_v52 = vpack.c.bf16 %v652_v47, %v651_v46  ;;  %v702_v55 = vmul.f32 %v2949_v36, %v2816_v17  ;;  %v703_v57 = vmul.f32 %v2814_v16, %v2958_v45  ;;  %v269_v16 = vpop.permute.xlu1 %268  ;;  %v267_v17 = vpop.permute.xlu0 %266 }
  0x96   : > { %344 = vrot.lane.b32.xlu1 %v2599_v53, %s2756_s19  ;;  %v2971_v53 = vpack.c.bf16 %v477_v48, %v477_v48  ;;  %v2762_v13 = vmov 0   ;;  %v271_v2 = vrot.slane %v269_v16, 4  ;;  %v270_v3 = vrot.slane %v267_v17, 4 }
  0x97   : > { %342 = vrot.lane.b32.xlu0 %v2598_v54, %s2756_s19  ;;  %v2607_v54 = vpack.c.bf16 %v476_v51, %v475_v50  ;;  %895 = vmatprep.mubr.bf16.mxu0 %v2762_v13  ;;  %v2624_v12 = vpack.c.bf16 %v703_v57, %v702_v55 }
  0x98   : > { %936 = vmatprep.mubr.bf16.mxu1 %v2762_v13 }
  0x99   : > { %v549_v58 = vpop.permute.xlu1 %548 }
  0x9a   : > { %575 = vrot.lane.b32.xlu1 %v2614_v60, %s2757_s20  ;;  %v547_v60 = vpop.permute.xlu0 %546 }
  0x9b   : > { %573 = vrot.lane.b32.xlu0 %v2613_v62, %s2757_s20  ;;  %v550_v15 = vrot.slane %v547_v60, 4 }
  0x9d   : > { %v2998_v61 = vpop.permute.xlu1 %454 }
  0x9e   : > { %602 = vrot.lane.b32.xlu1 %v2616_v6, %s2756_s19  ;;  %v3000_v62 = vpop.permute.xlu0 %452 }
  0x9f   : > { %600 = vrot.lane.b32.xlu0 %v2615_v9, %s2756_s19  ;;  %v272_v9 = vsel %vm246_vm1, %v270_v3, %v271_v2 }
  0xa0   : > { %v274_v25 = vsel %vm273_vm2, %v267_v17, %v272_v9 }
  0xa1   : > { %v3002_v63 = vpop.permute.xlu1 %691 }
  0xa2   : > { %392 = vrot.lane.b32.xlu1 %v2918_v10, %s2754_s14  ;;  %v3004_v1 = vpop.permute.xlu0 %689 }
  0xa3   : > { %390 = vrot.lane.b32.xlu0 %v2601_v11, %s2754_s14  ;;  %v551_v11 = vrot.slane %v549_v58, 4 }
  0xa5   : > { %v552_v31 = vsel %vm246_vm1, %v550_v15, %v551_v11 }
  0xa6   : > { %640 = vrot.lane.b32.xlu1 %v2918_v10, %s2754_s14 }
  0xa7   : > { %638 = vrot.lane.b32.xlu0 %v2618_v37, %s2754_s14 }
  0xaa   : > { %429 = vrot.lane.b32.xlu1 %v2951_v39, %s2755_s18 }
  0xab   : > { %427 = vrot.lane.b32.xlu0 %v2603_v43, %s2755_s18  ;;  %v553_v43 = vsel %vm273_vm2, %v547_v60, %v552_v31 }
  0xae   : > { %667 = vrot.lane.b32.xlu1 %v2951_v39, %s2755_s18 }
  0xaf   : > { %665 = vrot.lane.b32.xlu0 %v2620_v52, %s2755_s18 }
  0xb2   : > { %491 = vrot.lane.b32.xlu1 %v2971_v53, %s2753_s13 }
  0xb3   : > { %489 = vrot.lane.b32.xlu0 %v2607_v54, %s2753_s13 }
  0xb6   : > { %718 = vrot.lane.b32.xlu1 %v2971_v53, %s2753_s13 }
  0xb7   : > { %716 = vrot.lane.b32.xlu0 %v2624_v12, %s2753_s13 }
  0xba   : > { %1102 = vrot.lane.b32.xlu1 %v2918_v10, %s2754_s14 }
  0xbe   : > { %1325 = vrot.lane.b32.xlu1 %v2918_v10, %s2754_s14 }
  0xc2   : > { %1129 = vrot.lane.b32.xlu1 %v2951_v39, %s2755_s18 }
  0xc6   : > { %1153 = vrot.lane.b32.xlu1 %v2760_v21, %s2761_s23 }
  0xca   : > { %1352 = vrot.lane.b32.xlu1 %v2951_v39, %s2755_s18 }
  0xfc   : > { %v243_v4 = vpop.permute.xlu1 %242 }
  0xfd   : > { %v245_v6 = vrot.slane %v243_v4, 4  ;;  %v241_v7 = vpop.permute.xlu0 %240 }
  0xfe   : > { %v244_v18 = vrot.slane %v241_v7, 4 }
 0x100   : > { %v247_v19 = vsel %vm246_vm1, %v244_v18, %v245_v6  ;;  %v525_v23 = vpop.permute.xlu1 %524 }
 0x101   : > { %v249_v26 = vsel %vm248_vm0, %v241_v7, %v247_v19  ;;  %v527_v29 = vrot.slane %v525_v23, 4  ;;  %v523_v30 = vpop.permute.xlu0 %522 }
 0x102   : > { %v526_v33 = vrot.slane %v523_v30, 4  ;;  %v2451_v35 = vcombine.high %v249_v26, %v274_v25  ;;  %v2450_v37 = vcombine.low %v249_v26, %v274_v25 }
 0x104   : > { %v528_v38 = vsel %vm246_vm1, %v526_v33, %v527_v29  ;;  %v308_v41 = vpop.permute.xlu1 %307  ;;  %863 = vmatprep.subr.bf16.mxu0 %v2451_v35 }
 0x105   : > { %v529_v46 = vsel %vm248_vm0, %v523_v30, %v528_v38  ;;  %v306_v47 = vpop.permute.xlu0 %305  ;;  %864 = vmatpush1.bf16.msra.mxu0 %v2450_v37  ;;  %v310_v48 = vrot.slane %v308_v41, 4 }
 0x106   : > { %v309_v50 = vrot.slane %v306_v47, 4  ;;  %v2453_v51 = vcombine.high %v529_v46, %v553_v43  ;;  %v2452_v52 = vcombine.low %v529_v46, %v553_v43  ;;  %v457_v46 = vrot.slane %v2998_v61, 4 }
 0x107   : > { %v694_v61 = vrot.slane %v3002_v63, 4 }
 0x108   : > { %v345_v54 = vpop.permute.xlu1 %344  ;;  %904 = vmatprep.subr.bf16.mxu1 %v2453_v51  ;;  %v311_v12 = vsel %vm246_vm1, %v309_v50, %v310_v48 }
 0x109   : > { %v347_v55 = vrot.slane %v345_v54, 4  ;;  %v343_v57 = vpop.permute.xlu0 %342  ;;  %905 = vmatpush1.bf16.msra.mxu1 %v2452_v52  ;;  %v313_v60 = vsel %vm312_vm8, %v306_v47, %v311_v12  ;;  %v456_v47 = vrot.slane %v3000_v62, 4 }
 0x10a   : > { %v346_v16 = vrot.slane %v343_v57, 4 }
 0x10c   : > { %v348_v17 = vsel %vm246_vm1, %v346_v16, %v347_v55  ;;  %v576_v58 = vpop.permute.xlu1 %575  ;;  %v458_v16 = vsel %vm246_vm1, %v456_v47, %v457_v46 }
 0x10d   : > { %v350_v2 = vsel %vm349_vm7, %v343_v57, %v348_v17  ;;  %v574_v3 = vpop.permute.xlu0 %573  ;;  %v578_v4 = vrot.slane %v576_v58, 4 }
 0x10e   : > { %v577_v6 = vrot.slane %v574_v3, 4  ;;  %v2455_v7 = vcombine.high %v313_v60, %v350_v2  ;;  %v2454_v9 = vcombine.low %v313_v60, %v350_v2  ;;  %v693_v2 = vrot.slane %v3004_v1, 4 }
 0x110   : > { %v603_v11 = vpop.permute.xlu1 %602  ;;  %865 = vmatprep.subr.bf16.mxu0 %v2455_v7  ;;  %v579_v19 = vsel %vm246_vm1, %v577_v6, %v578_v4 }
 0x111   : > { %v605_v15 = vrot.slane %v603_v11, 4  ;;  %v601_v18 = vpop.permute.xlu0 %600  ;;  %866 = vmatpush1.bf16.msra.mxu0 %v2454_v9  ;;  %v580_v29 = vsel %vm312_vm8, %v574_v3, %v579_v19  ;;  %v460_v9 = vsel %vm459_vm3, %v3000_v62, %v458_v16 }
 0x112   : > { %v604_v23 = vrot.slane %v601_v18, 4 }
 0x114   : > { %v606_v25 = vsel %vm246_vm1, %v604_v23, %v605_v15  ;;  %v393_v26 = vpop.permute.xlu1 %392 }
 0x115   : > { %v607_v30 = vsel %vm349_vm7, %v601_v18, %v606_v25  ;;  %v395_v31 = vrot.slane %v393_v26, 4  ;;  %v391_v33 = vpop.permute.xlu0 %390  ;;  %v695_v18 = vsel %vm246_vm1, %v693_v2, %v694_v61  ;;  %v726_v2 = vld [vmem:[%s3399_s1] sm:$0xf] }
 0x116   : > { %v394_v35 = vrot.slane %v391_v33, 4  ;;  %v2457_v37 = vcombine.high %v580_v29, %v607_v30  ;;  %v2456_v38 = vcombine.low %v580_v29, %v607_v30  ;;  %v696_v29 = vsel %vm459_vm3, %v3004_v1, %v695_v18 }
 0x118   : > { %v396_v41 = vsel %vm246_vm1, %v394_v35, %v395_v31  ;;  %v641_v43 = vpop.permute.xlu1 %640  ;;  %906 = vmatprep.subr.bf16.mxu1 %v2457_v37 }
 0x119   : > { %v398_v48 = vsel %vm323_vm6, %v391_v33, %v396_v41  ;;  %v643_v50 = vrot.slane %v641_v43, 4  ;;  %v639_v51 = vpop.permute.xlu0 %638  ;;  %907 = vmatpush1.bf16.msra.mxu1 %v2456_v38  ;;  %v2763_v38 = vmov 65535   ;;  %v745_v43 = vld [vmem:[#allocation3 + $0x90] sm:$0x11] }
 0x11a   : > { %v642_v52 = vrot.slane %v639_v51, 4  ;;  %v2459_v54 = vcombine.high %v2828_v20, %v398_v48  ;;  %v2458_v55 = vcombine.low %v2828_v20, %v398_v48  ;;  %v849_v41 = vsel %vm246_vm1, 4294967295, %v2763_v38 }
 0x11c   : > { %v644_v57 = vsel %vm246_vm1, %v642_v52, %v643_v50  ;;  %v430_v12 = vpop.permute.xlu1 %429  ;;  %867 = vmatprep.subr.bf16.mxu0 %v2459_v54 }
 0x11d   : > { %v645_v17 = vsel %vm323_vm6, %v639_v51, %v644_v57  ;;  %v432_v58 = vrot.slane %v430_v12, 4  ;;  %v428_v60 = vpop.permute.xlu0 %427  ;;  %868 = vmatpush1.bf16.msra.mxu0 %v2458_v55  ;;  %v3047_v51 = vsel %vm848_vm9, %v849_v41, 0  ;;  %v746_v57 = vld [vmem:[#allocation3 + $0x98] sm:$0x11] }
 0x11e   : > { %v431_v3 = vrot.slane %v428_v60, 4  ;;  %v2461_v4 = vcombine.high %v2836_v22, %v645_v17  ;;  %v2460_v20 = vcombine.low %v2836_v22, %v645_v17 }
 0x120   : > { %v433_v6 = vsel %vm246_vm1, %v431_v3, %v432_v58  ;;  %v668_v7 = vpop.permute.xlu1 %667  ;;  %908 = vmatprep.subr.bf16.mxu1 %v2461_v4 }
 0x121   : > { %v435_v63 = vsel %vm286_vm5, %v428_v60, %v433_v6  ;;  %v670_v11 = vrot.slane %v668_v7, 4  ;;  %v666_v15 = vpop.permute.xlu0 %665  ;;  %909 = vmatpush1.bf16.msra.mxu1 %v2460_v20 }
 0x122   : > { %v669_v19 = vrot.slane %v666_v15, 4  ;;  %v2463_v23 = vcombine.high %v435_v63, %v460_v9  ;;  %v2462_v25 = vcombine.low %v435_v63, %v460_v9 }
 0x124   : > { %v671_v26 = vsel %vm246_vm1, %v669_v19, %v670_v11  ;;  %v492_v22 = vpop.permute.xlu1 %491  ;;  %869 = vmatprep.subr.bf16.mxu0 %v2463_v23 }
 0x125   : > { %v672_v30 = vsel %vm286_vm5, %v666_v15, %v671_v26  ;;  %v494_v62 = vrot.slane %v492_v22, 4  ;;  %v490_v31 = vpop.permute.xlu0 %489  ;;  %870 = vmatpush1.bf16.msra.mxu0 %v2462_v25 }
 0x126   : > { %v493_v33 = vrot.slane %v490_v31, 4  ;;  %v2465_v35 = vcombine.high %v672_v30, %v696_v29  ;;  %v2464_v37 = vcombine.low %v672_v30, %v696_v29 }
 0x128   : > { %v495_v46 = vsel %vm246_vm1, %v493_v33, %v494_v62  ;;  %v719_v47 = vpop.permute.xlu1 %718  ;;  %910 = vmatprep.subr.bf16.mxu1 %v2465_v35 }
 0x129   : > { %v497_v48 = vsel %vm221_vm4, %v490_v31, %v495_v46  ;;  %v721_v1 = vrot.slane %v719_v47, 4  ;;  %v717_v50 = vpop.permute.xlu0 %716  ;;  %911 = vmatpush1.bf16.msra.mxu1 %v2464_v37 }
 0x12a   : > { %v720_v52 = vrot.slane %v717_v50, 4  ;;  %v2467_v54 = vcombine.high %v497_v48, %v745_v43  ;;  %v2466_v55 = vcombine.low %v497_v48, %v745_v43 }
 0x12c   : > { %v722_v12 = vsel %vm246_vm1, %v720_v52, %v721_v1  ;;  %v855_v16 = vand.u32 %v2467_v54, %v3047_v51  ;;  %v852_v61 = vand.u32 %v2466_v55, %v3047_v51 }
 0x12d   : > { %v723_v17 = vsel %vm221_vm4, %v717_v50, %v722_v12 }
 0x12e   : > { %871 = vmatprep.subr.bf16.mxu0 %v855_v16  ;;  %v2469_v58 = vcombine.high %v723_v17, %v746_v57  ;;  %v2468_v60 = vcombine.low %v723_v17, %v746_v57 }
 0x12f   : > { %872 = vmatpush1.bf16.msra.mxu0 %v852_v61 }
 0x130   : > { %v861_v3 = vand.u32 %v2469_v58, %v3047_v51  ;;  %v858_v4 = vand.u32 %v2468_v60, %v3047_v51 }
 0x132   : > { %2470 = vmatmul.mubr.msk.bf16.vlgmr.msra.gmra.mrb[0].mxu0 %vm843_vm10, %v726_v2  ;;  %912 = vmatprep.subr.bf16.mxu1 %v861_v3 }
 0x133   : > { %913 = vmatpush1.bf16.msra.mxu1 %v858_v4  ;;  %1576 = vmatprep.mubr.bf16.mxu0 %v2762_v13 }
 0x136   : > { %2471 = vmatmul.mubr.msk.bf16.vlgmr.msra.gmra.mrb[0].mxu1 %vm843_vm10, %v726_v2 }
 0x137   : > { %1617 = vmatprep.mubr.bf16.mxu1 %v2762_v13 }
 0x205   : > { %v897_v20 = vpop.f32.mrb[0].mxu0 }
 0x206   : > { %v945_v6 = vadd.f32 3.0, %v897_v20  ;;  %v899_v7 = vpop.f32.mrb[1].mxu0 }
 0x207   : > { %v946_v9 = vadd.f32 3.0, %v899_v7  ;;  %v901_v63 = vpop.f32.mrb[2].mxu0 }
 0x208   : > { %v949_v11 = vmax.f32 %v945_v6, 0.0  ;;  %v902_v15 = vpop.f32.mrb[3].mxu0 }
 0x209   : > { %v950_v18 = vmax.f32 %v946_v9, 0.0  ;;  %v938_v19 = vpop.f32.mrb[0].mxu1 }
 0x20a   : > { %v953_v23 = vmin.f32 %v949_v11, 6.0  ;;  %v947_v25 = vadd.f32 3.0, %v938_v19  ;;  %v940_v26 = vpop.f32.mrb[1].mxu1 }
 0x20b   : > { %v954_v22 = vmin.f32 %v950_v18, 6.0  ;;  %v948_v29 = vadd.f32 3.0, %v940_v26  ;;  %v942_v30 = vpop.f32.mrb[2].mxu1 }
 0x20c   : > { %v957_v62 = vmul.f32 %v953_v23, %v897_v20  ;;  %v951_v31 = vmax.f32 %v947_v25, 0.0  ;;  %v943_v33 = vpop.f32.mrb[3].mxu1 }
 0x20d   : > { %v958_v35 = vmul.f32 %v954_v22, %v899_v7  ;;  %v952_v37 = vmax.f32 %v948_v29, 0.0 }
 0x20e   : > { %v961_v38 = vmul.f32 0.16666667, %v957_v62  ;;  %v955_v41 = vmin.f32 %v951_v31, 6.0 }
 0x20f   : > { %v962_v43 = vmul.f32 0.16666667, %v958_v35  ;;  %v956_v46 = vmin.f32 %v952_v37, 6.0 }
 0x210   : > { %v959_v47 = vmul.f32 %v955_v41, %v938_v19  ;;  %v2628_v48 = vpack.c.bf16 %v961_v38, %v2752_v5  ;;  %v1086_v17 = vmul.f32 %v2892_v56, %v961_v38  ;;  %v1113_v20 = vmul.f32 %v2915_v8, %v961_v38 }
 0x211   : > { %v960_v1 = vmul.f32 %v956_v46, %v940_v26  ;;  %v2629_v50 = vpack.c.bf16 %v962_v43, %v962_v43  ;;  %v3063_v52 = vpack.c.bf16 %v962_v43, %v961_v38  ;;  %v972_v12 = vmul.f32 %v2842_v24, %v962_v43 }
 0x212   : > { %v963_v54 = vmul.f32 0.16666667, %v959_v47  ;;  %1008 = vrot.lane.b32.xlu0 %v2628_v48, %s2759_s22  ;;  %v1087_v60 = vmul.f32 %v962_v43, %v2902_v59  ;;  %v1114_v6 = vmul.f32 %v962_v43, %v2924_v14  ;;  %v1164_v11 = vmul.f32 %v2949_v36, %v961_v38 }
 0x213   : > { %v964_v55 = vmul.f32 0.16666667, %v960_v1  ;;  %1010 = vrot.lane.b32.xlu1 %v2629_v50, %s2759_s22  ;;  %v2627_v58 = vpack.c.bf16 %v972_v12, %v972_v12  ;;  %v1165_v19 = vmul.f32 %v962_v43, %v2958_v45  ;;  %v971_v25 = vmul.f32 %v961_v38, %v2846_v27 }
 0x214   : > { %v2645_v57 = vpack.c.bf16 %v963_v54, %v2752_v5  ;;  %v1309_v2 = vmul.f32 %v2892_v56, %v963_v54  ;;  %v2635_v7 = vpack.c.bf16 %v1087_v60, %v1086_v17  ;;  %v1336_v9 = vmul.f32 %v2915_v8, %v963_v54 }
 0x215   : > { %v2646_v16 = vpack.c.bf16 %v964_v55, %v964_v55  ;;  %v3069_v61 = vpack.c.bf16 %v964_v55, %v963_v54  ;;  %v1195_v3 = vmul.f32 %v2842_v24, %v964_v55  ;;  %v1310_v4 = vmul.f32 %v964_v55, %v2902_v59 }
 0x216   : > { %1231 = vrot.lane.b32.xlu0 %v2645_v57, %s2759_s22  ;;  %v1337_v63 = vmul.f32 %v964_v55, %v2924_v14  ;;  %v2637_v18 = vpack.c.bf16 %v1114_v6, %v1113_v20  ;;  %v1387_v23 = vmul.f32 %v2949_v36, %v963_v54  ;;  %v1388_v22 = vmul.f32 %v964_v55, %v2958_v45 }
 0x217   : > { %1233 = vrot.lane.b32.xlu1 %v2646_v16, %s2759_s22  ;;  %v2652_v15 = vpack.c.bf16 %v1310_v4, %v1309_v2  ;;  %v2644_v29 = vpack.c.bf16 %v1195_v3, %v1195_v3  ;;  %v1023_v30 = vmul.f32 %v2856_v34, %v962_v43  ;;  %v2641_v62 = vpack.c.bf16 %v1165_v19, %v1164_v11 }
 0x218   : > { %v2654_v26 = vpack.c.bf16 %v1337_v63, %v1336_v9  ;;  %v2658_v31 = vpack.c.bf16 %v1388_v22, %v1387_v23  ;;  %v2626_v33 = vpack.c.bf16 %v971_v25, %v2848_v28  ;;  %v1194_v35 = vmul.f32 %v963_v54, %v2846_v27 }
 0x219   : > { %v2631_v37 = vpack.c.bf16 %v1023_v30, %v1023_v30  ;;  %v1050_v41 = vmul.f32 %v2854_v32, %v962_v43  ;;  %v1022_v47 = vmul.f32 %v961_v38, %v2865_v40  ;;  %v1246_v1 = vmul.f32 %v2856_v34, %v964_v55 }
 0x21a   : > { %1151 = vrot.lane.b32.xlu0 %v3063_v52, %s2761_s23  ;;  %v2643_v46 = vpack.c.bf16 %v1194_v35, %v2848_v28  ;;  %v1049_v57 = vmul.f32 %v961_v38, %v2877_v44  ;;  %v1273_v12 = vmul.f32 %v2854_v32, %v964_v55  ;;  %v1245_v17 = vmul.f32 %v963_v54, %v2865_v40 }
 0x21b   : > { %986 = vrot.lane.b32.xlu1 %v2627_v58, %s2758_s21  ;;  %v2633_v48 = vpack.c.bf16 %v1050_v41, %v1050_v41  ;;  %v2630_v50 = vpack.c.bf16 %v1022_v47, %v2870_v42  ;;  %v2648_v43 = vpack.c.bf16 %v1246_v1, %v1246_v1  ;;  %v1272_v38 = vmul.f32 %v963_v54, %v2877_v44  ;;  %v3140_v54 = vpop.permute.xlu1 %1102 }
 0x21c   : > { %v2632_v16 = vpack.c.bf16 %v1049_v57, %v2883_v49  ;;  %v2650_v58 = vpack.c.bf16 %v1273_v12, %v1273_v12  ;;  %v2647_v60 = vpack.c.bf16 %v1245_v17, %v2870_v42 }
 0x21d   : > { %v2649_v55 = vpack.c.bf16 %v1272_v38, %v2883_v49 }
 0x21e   : > { %1374 = vrot.lane.b32.xlu0 %v3069_v61, %s2761_s23 }
 0x21f   : > { %1209 = vrot.lane.b32.xlu1 %v2644_v29, %s2758_s21  ;;  %v3142_v2 = vpop.permute.xlu1 %1325 }
 0x222   : > { %984 = vrot.lane.b32.xlu0 %v2626_v33, %s2758_s21 }
 0x223   : > { %1037 = vrot.lane.b32.xlu1 %v2631_v37, %s2757_s20 }
 0x226   : > { %1207 = vrot.lane.b32.xlu0 %v2643_v46, %s2758_s21 }
 0x227   : > { %1064 = vrot.lane.b32.xlu1 %v2633_v48, %s2756_s19 }
 0x22a   : > { %1035 = vrot.lane.b32.xlu0 %v2630_v50, %s2757_s20 }
 0x22b   : > { %1260 = vrot.lane.b32.xlu1 %v2648_v43, %s2757_s20 }
 0x22e   : > { %1062 = vrot.lane.b32.xlu0 %v2632_v16, %s2756_s19 }
 0x22f   : > { %1287 = vrot.lane.b32.xlu1 %v2650_v58, %s2756_s19 }
 0x232   : > { %1258 = vrot.lane.b32.xlu0 %v2647_v60, %s2757_s20 }
 0x233   : > { %1376 = vrot.lane.b32.xlu1 %v2760_v21, %s2761_s23 }
 0x236   : > { %1285 = vrot.lane.b32.xlu0 %v2649_v55, %s2756_s19 }
 0x237   : > { %1180 = vrot.lane.b32.xlu1 %v2971_v53, %s2753_s13 }
 0x23a   : > { %1100 = vrot.lane.b32.xlu0 %v2635_v7, %s2754_s14 }
 0x23b   : > { %1403 = vrot.lane.b32.xlu1 %v2971_v53, %s2753_s13 }
 0x23e   : > { %1323 = vrot.lane.b32.xlu0 %v2652_v15, %s2754_s14 }
 0x23f   : > { %1783 = vrot.lane.b32.xlu1 %v2918_v10, %s2754_s14 }
 0x242   : > { %1127 = vrot.lane.b32.xlu0 %v2637_v18, %s2755_s18 }
 0x243   : > { %2006 = vrot.lane.b32.xlu1 %v2918_v10, %s2754_s14  ;;  %v3144_v10 = vpop.permute.xlu1 %1129 }
 0x246   : > { %1350 = vrot.lane.b32.xlu0 %v2654_v26, %s2755_s18 }
 0x247   : > { %1810 = vrot.lane.b32.xlu1 %v2951_v39, %s2755_s18  ;;  %v3146_v3 = vpop.permute.xlu1 %1153 }
 0x24a   : > { %1178 = vrot.lane.b32.xlu0 %v2641_v62, %s2753_s13 }
 0x24b   : > { %1834 = vrot.lane.b32.xlu1 %v2760_v21, %s2761_s23  ;;  %v3148_v4 = vpop.permute.xlu1 %1352 }
 0x24e   : > { %1401 = vrot.lane.b32.xlu0 %v2658_v31, %s2753_s13 }
 0x24f   : > { %2033 = vrot.lane.b32.xlu1 %v2951_v39, %s2755_s18 }
 0x284   : > { %v1009_v20 = vpop.permute.xlu0 %1008 }
 0x285   : > { %v1011_v6 = vpop.permute.xlu1 %1010  ;;  %v1012_v39 = vrot.slane %v1009_v20, 4 }
 0x286   : > { %v1013_v18 = vrot.slane %v1011_v6, 4 }
 0x288   : > { %v1232_v7 = vpop.permute.xlu0 %1231  ;;  %v1014_v22 = vsel %vm246_vm1, %v1012_v39, %v1013_v18 }
 0x289   : > { %v1234_v9 = vpop.permute.xlu1 %1233  ;;  %v1235_v23 = vrot.slane %v1232_v7, 4  ;;  %v1015_v33 = vsel %vm273_vm2, %v1009_v20, %v1014_v22 }
 0x28a   : > { %v1236_v25 = vrot.slane %v1234_v9, 4 }
 0x28c   : > { %v3150_v63 = vpop.permute.xlu0 %1151  ;;  %v1237_v35 = vsel %vm246_vm1, %v1235_v23, %v1236_v25 }
 0x28d   : > { %v987_v11 = vpop.permute.xlu1 %986  ;;  %v1238_v43 = vsel %vm273_vm2, %v1232_v7, %v1237_v35 }
 0x28e   : > { %v989_v29 = vrot.slane %v987_v11, 4 }
 0x290   : > { %v3152_v15 = vpop.permute.xlu0 %1374 }
 0x291   : > { %v1210_v19 = vpop.permute.xlu1 %1209 }
 0x292   : > { %v1212_v46 = vrot.slane %v1210_v19, 4 }
 0x294   : > { %v985_v26 = vpop.permute.xlu0 %984 }
 0x295   : > { %v988_v30 = vrot.slane %v985_v26, 4  ;;  %v1038_v62 = vpop.permute.xlu1 %1037 }
 0x296   : > { %v1040_v38 = vrot.slane %v1038_v62, 4 }
 0x297   : > { %v990_v31 = vsel %vm246_vm1, %v988_v30, %v989_v29 }
 0x298   : > { %v991_v37 = vsel %vm248_vm0, %v985_v26, %v990_v31  ;;  %v1208_v41 = vpop.permute.xlu0 %1207 }
 0x299   : > { %v1211_v47 = vrot.slane %v1208_v41, 4  ;;  %v2508_v48 = vcombine.high %v991_v37, %v1015_v33  ;;  %v2507_v1 = vcombine.low %v991_v37, %v1015_v33  ;;  %v1065_v50 = vpop.permute.xlu1 %1064 }
 0x29a   : > { %v1067_v6 = vrot.slane %v1065_v50, 4 }
 0x29b   : > { %v1213_v57 = vsel %vm246_vm1, %v1211_v47, %v1212_v46  ;;  %1544 = vmatprep.subr.bf16.mxu0 %v2508_v48  ;;  %v1105_v47 = vrot.slane %v3140_v54, 4 }
 0x29c   : > { %v1214_v12 = vsel %vm248_vm0, %v1208_v41, %v1213_v57  ;;  %v1036_v16 = vpop.permute.xlu0 %1035  ;;  %1545 = vmatpush1.bf16.msra.mxu0 %v2507_v1 }
 0x29d   : > { %v1039_v17 = vrot.slane %v1036_v16, 4  ;;  %v2510_v58 = vcombine.high %v1214_v12, %v1238_v43  ;;  %v2509_v60 = vcombine.low %v1214_v12, %v1238_v43  ;;  %v1261_v55 = vpop.permute.xlu1 %1260  ;;  %v1156_v43 = vrot.slane %v3146_v3, 4 }
 0x29e   : > { %v1263_v29 = vrot.slane %v1261_v55, 4  ;;  %v1155_v12 = vrot.slane %v3150_v63, 4 }
 0x29f   : > { %1585 = vmatprep.subr.bf16.mxu1 %v2510_v58  ;;  %v1041_v9 = vsel %vm246_vm1, %v1039_v17, %v1040_v38  ;;  %v1328_v58 = vrot.slane %v3142_v2, 4 }
 0x2a0   : > { %v1063_v20 = vpop.permute.xlu0 %1062  ;;  %1586 = vmatpush1.bf16.msra.mxu1 %v2509_v60  ;;  %v1042_v7 = vsel %vm312_vm8, %v1036_v16, %v1041_v9  ;;  %v1157_v3 = vsel %vm246_vm1, %v1155_v12, %v1156_v43 }
 0x2a1   : > { %v1066_v11 = vrot.slane %v1063_v20, 4  ;;  %v1288_v22 = vpop.permute.xlu1 %1287 }
 0x2a2   : > { %v1290_v62 = vrot.slane %v1288_v22, 4 }
 0x2a3   : > { %v1068_v39 = vsel %vm246_vm1, %v1066_v11, %v1067_v6  ;;  %v1132_v6 = vrot.slane %v3144_v10, 4  ;;  %v1158_v10 = vsel %vm459_vm3, %v3150_v63, %v1157_v3 }
 0x2a4   : > { %v1069_v18 = vsel %vm349_vm7, %v1063_v20, %v1068_v39  ;;  %v1259_v19 = vpop.permute.xlu0 %1258 }
 0x2a5   : > { %v1262_v23 = vrot.slane %v1259_v19, 4  ;;  %v2512_v25 = vcombine.high %v1042_v7, %v1069_v18  ;;  %v2511_v26 = vcombine.low %v1042_v7, %v1069_v18  ;;  %v1377_v55 = vpop.permute.xlu1 %1376 }
 0x2a6   : > { %v1379_v39 = vrot.slane %v1377_v55, 4 }
 0x2a7   : > { %1546 = vmatprep.subr.bf16.mxu0 %v2512_v25  ;;  %v1264_v31 = vsel %vm246_vm1, %v1262_v23, %v1263_v29  ;;  %v1355_v23 = vrot.slane %v3148_v4, 4 }
 0x2a8   : > { %v1286_v30 = vpop.permute.xlu0 %1285  ;;  %1547 = vmatpush1.bf16.msra.mxu0 %v2511_v26  ;;  %v1265_v37 = vsel %vm312_vm8, %v1259_v19, %v1264_v31 }
 0x2a9   : > { %v1289_v33 = vrot.slane %v1286_v30, 4  ;;  %v1181_v25 = vpop.permute.xlu1 %1180 }
 0x2aa   : > { %v1183_v63 = vrot.slane %v1181_v25, 4 }
 0x2ab   : > { %v1291_v35 = vsel %vm246_vm1, %v1289_v33, %v1290_v62 }
 0x2ac   : > { %v1292_v41 = vsel %vm349_vm7, %v1286_v30, %v1291_v35  ;;  %v1101_v46 = vpop.permute.xlu0 %1100 }
 0x2ad   : > { %v1104_v48 = vrot.slane %v1101_v46, 4  ;;  %v2514_v1 = vcombine.high %v1265_v37, %v1292_v41  ;;  %v2513_v50 = vcombine.low %v1265_v37, %v1292_v41 }
 0x2af   : > { %v1106_v57 = vsel %vm246_vm1, %v1104_v48, %v1105_v47  ;;  %1587 = vmatprep.subr.bf16.mxu1 %v2514_v1  ;;  %v1404_v47 = vpop.permute.xlu1 %1403  ;;  %v1431_v48 = vld [vmem:[#allocation3 + $0x90] sm:$0x11] }
 0x2b0   : > { %v1107_v16 = vsel %vm323_vm6, %v1101_v46, %v1106_v57  ;;  %v1324_v17 = vpop.permute.xlu0 %1323  ;;  %1588 = vmatpush1.bf16.msra.mxu1 %v2513_v50  ;;  %v1406_v43 = vrot.slane %v1404_v47, 4 }
 0x2b1   : > { %v1327_v60 = vrot.slane %v1324_v17, 4  ;;  %v2516_v38 = vcombine.high %v3063_v52, %v1107_v16  ;;  %v2515_v54 = vcombine.low %v3063_v52, %v1107_v16  ;;  %v1378_v52 = vrot.slane %v3152_v15, 4 }
 0x2b3   : > { %v1329_v20 = vsel %vm246_vm1, %v1327_v60, %v1328_v58  ;;  %1548 = vmatprep.subr.bf16.mxu0 %v2516_v38  ;;  %v1380_v29 = vsel %vm246_vm1, %v1378_v52, %v1379_v39 }
 0x2b4   : > { %v1330_v9 = vsel %vm323_vm6, %v1324_v17, %v1329_v20  ;;  %v1128_v11 = vpop.permute.xlu0 %1127  ;;  %1549 = vmatpush1.bf16.msra.mxu0 %v2515_v54  ;;  %v1381_v33 = vsel %vm459_vm3, %v3152_v15, %v1380_v29  ;;  %v1432_v17 = vld [vmem:[#allocation3 + $0x98] sm:$0x11] }
 0x2b5   : > { %v1131_v7 = vrot.slane %v1128_v11, 4  ;;  %v2518_v2 = vcombine.high %v3069_v61, %v1330_v9  ;;  %v2517_v18 = vcombine.low %v3069_v61, %v1330_v9 }
 0x2b7   : > { %v1133_v19 = vsel %vm246_vm1, %v1131_v7, %v1132_v6  ;;  %1589 = vmatprep.subr.bf16.mxu1 %v2518_v2  ;;  %v2506_v6 = vld [vmem:[%s3399_s1 + $0x4] sm:$0xf] }
 0x2b8   : > { %v1134_v26 = vsel %vm286_vm5, %v1128_v11, %v1133_v19  ;;  %v1351_v22 = vpop.permute.xlu0 %1350  ;;  %1590 = vmatpush1.bf16.msra.mxu1 %v2517_v18 }
 0x2b9   : > { %v1354_v30 = vrot.slane %v1351_v22, 4  ;;  %v2520_v62 = vcombine.high %v1134_v26, %v1158_v10  ;;  %v2519_v61 = vcombine.low %v1134_v26, %v1158_v10 }
 0x2bb   : > { %v1356_v31 = vsel %vm246_vm1, %v1354_v30, %v1355_v23  ;;  %1550 = vmatprep.subr.bf16.mxu0 %v2520_v62 }
 0x2bc   : > { %v1357_v4 = vsel %vm286_vm5, %v1351_v22, %v1356_v31  ;;  %v1179_v35 = vpop.permute.xlu0 %1178  ;;  %1551 = vmatpush1.bf16.msra.mxu0 %v2519_v61 }
 0x2bd   : > { %v1182_v37 = vrot.slane %v1179_v35, 4  ;;  %v2522_v41 = vcombine.high %v1357_v4, %v1381_v33  ;;  %v2521_v46 = vcombine.low %v1357_v4, %v1381_v33 }
 0x2bf   : > { %v1184_v1 = vsel %vm246_vm1, %v1182_v37, %v1183_v63  ;;  %1591 = vmatprep.subr.bf16.mxu1 %v2522_v41 }
 0x2c0   : > { %v1185_v50 = vsel %vm221_vm4, %v1179_v35, %v1184_v1  ;;  %v1402_v57 = vpop.permute.xlu0 %1401  ;;  %1592 = vmatpush1.bf16.msra.mxu1 %v2521_v46 }
 0x2c1   : > { %v1405_v12 = vrot.slane %v1402_v57, 4  ;;  %v2523_v15 = vcombine.low %v1185_v50, %v1431_v48  ;;  %v2524_v16 = vcombine.high %v1185_v50, %v1431_v48 }
 0x2c3   : > { %v1407_v58 = vsel %vm246_vm1, %v1405_v12, %v1406_v43  ;;  %v1536_v60 = vand.u32 %v2524_v16, %v3047_v51  ;;  %v1533_v38 = vand.u32 %v2523_v15, %v3047_v51 }
 0x2c4   : > { %v1408_v54 = vsel %vm221_vm4, %v1402_v57, %v1407_v58 }
 0x2c5   : > { %1552 = vmatprep.subr.bf16.mxu0 %v1536_v60  ;;  %v2525_v55 = vcombine.low %v1408_v54, %v1432_v17  ;;  %v2526_v20 = vcombine.high %v1408_v54, %v1432_v17 }
 0x2c6   : > { %1553 = vmatpush1.bf16.msra.mxu0 %v1533_v38 }
 0x2c7   : > { %v1542_v3 = vand.u32 %v2526_v20, %v3047_v51  ;;  %v1539_v9 = vand.u32 %v2525_v55, %v3047_v51 }
 0x2c9   : > { %2527 = vmatmul.mubr.msk.bf16.vlgmr.msra.gmra.mrb[4].mxu0 %vm843_vm10, %v2506_v6  ;;  %1593 = vmatprep.subr.bf16.mxu1 %v1542_v3 }
 0x2ca   : > { %1594 = vmatpush1.bf16.msra.mxu1 %v1539_v9  ;;  %2257 = vmatprep.mubr.bf16.mxu0 %v2762_v13 }
 0x2cd   : > { %2528 = vmatmul.mubr.msk.bf16.vlgmr.msra.gmra.mrb[4].mxu1 %vm843_vm10, %v2506_v6 }
 0x2ce   : > { %2298 = vmatprep.mubr.bf16.mxu1 %v2762_v13 }
 0x39c   : > { %v1578_v11 = vpop.f32.mrb[4].mxu0 }
 0x39d   : > { %v1626_v39 = vadd.f32 3.0, %v1578_v11  ;;  %v1580_v7 = vpop.f32.mrb[5].mxu0 }
 0x39e   : > { %v1627_v2 = vadd.f32 3.0, %v1580_v7  ;;  %v1582_v18 = vpop.f32.mrb[6].mxu0 }
 0x39f   : > { %v1630_v52 = vmax.f32 %v1626_v39, 0.0  ;;  %v1583_v19 = vpop.f32.mrb[7].mxu0 }
 0x3a0   : > { %v1631_v23 = vmax.f32 %v1627_v2, 0.0  ;;  %v1619_v10 = vpop.f32.mrb[4].mxu1 }
 0x3a1   : > { %v1634_v25 = vmin.f32 %v1630_v52, 6.0  ;;  %v1628_v26 = vadd.f32 3.0, %v1619_v10  ;;  %v1621_v22 = vpop.f32.mrb[5].mxu1 }
 0x3a2   : > { %v1635_v29 = vmin.f32 %v1631_v23, 6.0  ;;  %v1629_v30 = vadd.f32 3.0, %v1621_v22  ;;  %v1623_v62 = vpop.f32.mrb[6].mxu1 }
 0x3a3   : > { %v1638_v61 = vmul.f32 %v1634_v25, %v1578_v11  ;;  %v1632_v31 = vmax.f32 %v1628_v26, 0.0  ;;  %v1624_v33 = vpop.f32.mrb[7].mxu1 }
 0x3a4   : > { %v1639_v4 = vmul.f32 %v1635_v29, %v1580_v7  ;;  %v1633_v13 = vmax.f32 %v1629_v30, 0.0 }
 0x3a5   : > { %v3210_v35 = vmul.f32 0.16666667, %v1638_v61  ;;  %v1636_v63 = vmin.f32 %v1632_v31, 6.0  ;;  %v3320_v31 = vpop.permute.xlu1 %1783 }
 0x3a6   : > { %v3212_v37 = vmul.f32 0.16666667, %v1639_v4  ;;  %v1637_v41 = vmin.f32 %v1633_v13, 6.0 }
 0x3a7   : > { %v1640_v46 = vmul.f32 %v1636_v63, %v1619_v10  ;;  %v2662_v47 = vpack.c.bf16 %v3210_v35, %v2752_v5  ;;  %v1703_v9 = vmul.f32 %v3210_v35, %v2865_v40  ;;  %v1730_v7 = vmul.f32 %v3210_v35, %v2877_v44 }
 0x3a8   : > { %v1641_v48 = vmul.f32 %v1637_v41, %v1621_v22  ;;  %v2663_v1 = vpack.c.bf16 %v3212_v37, %v3212_v37  ;;  %v3220_v50 = vpack.c.bf16 %v3212_v37, %v3210_v35  ;;  %v1653_v16 = vmul.f32 %v2842_v24, %v3212_v37 }
 0x3a9   : > { %v3222_v57 = vmul.f32 0.16666667, %v1640_v46  ;;  %1689 = vrot.lane.b32.xlu0 %v2662_v47, %s2759_s22  ;;  %v1704_v54 = vmul.f32 %v2856_v34, %v3212_v37  ;;  %v1731_v6 = vmul.f32 %v2854_v32, %v3212_v37  ;;  %v2666_v18 = vpack.c.bf16 %v1730_v7, %v2883_v49  ;;  %v3322_v33 = vpop.permute.xlu1 %2006 }
 0x3aa   : > { %v3225_v43 = vmul.f32 0.16666667, %v1641_v48  ;;  %1691 = vrot.lane.b32.xlu1 %v2663_v1, %s2759_s22  ;;  %v2661_v58 = vpack.c.bf16 %v1653_v16, %v1653_v16  ;;  %v1768_v10 = vmul.f32 %v3212_v37, %v2902_v59  ;;  %v1794_v25 = vmul.f32 %v2915_v8, %v3210_v35 }
 0x3ab   : > { %v2679_v12 = vpack.c.bf16 %v3222_v57, %v2752_v5  ;;  %v1652_v5 = vmul.f32 %v3210_v35, %v2846_v27  ;;  %v2665_v20 = vpack.c.bf16 %v1704_v54, %v1704_v54  ;;  %v2667_v11 = vpack.c.bf16 %v1731_v6, %v1731_v6 }
 0x3ac   : > { %v2680_v15 = vpack.c.bf16 %v3225_v43, %v3225_v43  ;;  %v3236_v17 = vpack.c.bf16 %v3225_v43, %v3222_v57  ;;  %v1876_v60 = vmul.f32 %v2842_v24, %v3225_v43  ;;  %v1875_v24 = vmul.f32 %v3222_v57, %v2846_v27 }
 0x3ad   : > { %1912 = vrot.lane.b32.xlu0 %v2679_v12, %s2759_s22  ;;  %v2660_v55 = vpack.c.bf16 %v1652_v5, %v2848_v28  ;;  %v1927_v39 = vmul.f32 %v2856_v34, %v3225_v43  ;;  %v2664_v27 = vpack.c.bf16 %v1703_v9, %v2870_v42  ;;  %v1926_v34 = vmul.f32 %v3222_v57, %v2865_v40  ;;  %v3324_v4 = vpop.permute.xlu1 %1810 }
 0x3ae   : > { %1914 = vrot.lane.b32.xlu1 %v2680_v15, %s2759_s22  ;;  %v2678_v38 = vpack.c.bf16 %v1876_v60, %v1876_v60  ;;  %v2677_v3 = vpack.c.bf16 %v1875_v24, %v2848_v28  ;;  %v1954_v28 = vmul.f32 %v2854_v32, %v3225_v43  ;;  %v1953_v23 = vmul.f32 %v3222_v57, %v2877_v44 }
 0x3af   : > { %v2682_v2 = vpack.c.bf16 %v1927_v39, %v1927_v39  ;;  %v2681_v19 = vpack.c.bf16 %v1926_v34, %v2870_v42  ;;  %v1767_v40 = vmul.f32 %v2892_v56, %v3210_v35  ;;  %v1990_v44 = vmul.f32 %v2892_v56, %v3222_v57 }
 0x3b0   : > { %v2684_v52 = vpack.c.bf16 %v1954_v28, %v1954_v28  ;;  %v2683_v32 = vpack.c.bf16 %v1953_v23, %v2883_v49  ;;  %v1795_v26 = vmul.f32 %v3212_v37, %v2924_v14  ;;  %v2017_v56 = vmul.f32 %v2915_v8, %v3222_v57 }
 0x3b1   : > { %1832 = vrot.lane.b32.xlu0 %v3220_v50, %s2761_s23  ;;  %v2669_v42 = vpack.c.bf16 %v1768_v10, %v1767_v40  ;;  %v1846_v30 = vmul.f32 %v3212_v37, %v2958_v45  ;;  %v2068_v61 = vmul.f32 %v2949_v36, %v3222_v57  ;;  %v2069_v8 = vmul.f32 %v3225_v43, %v2958_v45  ;;  %v1835_v13 = vpop.permute.xlu1 %1834 }
 0x3b2   : > { %1667 = vrot.lane.b32.xlu1 %v2661_v58, %s2758_s21  ;;  %v2671_v22 = vpack.c.bf16 %v1795_v26, %v1794_v25  ;;  %v1837_v58 = vrot.slane %v1835_v13, 4 }
 0x3b5   : > { %2055 = vrot.lane.b32.xlu0 %v3236_v17, %s2761_s23  ;;  %v3326_v63 = vpop.permute.xlu1 %2033 }
 0x3b6   : > { %1890 = vrot.lane.b32.xlu1 %v2678_v38, %s2758_s21 }
 0x3b9   : > { %1665 = vrot.lane.b32.xlu0 %v2660_v55, %s2758_s21 }
 0x3ba   : > { %1718 = vrot.lane.b32.xlu1 %v2665_v20, %s2757_s20 }
 0x3bd   : > { %1888 = vrot.lane.b32.xlu0 %v2677_v3, %s2758_s21 }
 0x3be   : > { %1745 = vrot.lane.b32.xlu1 %v2667_v11, %s2756_s19 }
 0x3c1   : > { %1716 = vrot.lane.b32.xlu0 %v2664_v27, %s2757_s20 }
 0x3c2   : > { %1941 = vrot.lane.b32.xlu1 %v2682_v2, %s2757_s20 }
 0x3c5   : > { %1743 = vrot.lane.b32.xlu0 %v2666_v18, %s2756_s19 }
 0x3c6   : > { %1968 = vrot.lane.b32.xlu1 %v2684_v52, %s2756_s19 }
 0x3c9   : > { %1939 = vrot.lane.b32.xlu0 %v2681_v19, %s2757_s20 }
 0x3ca   : > { %2057 = vrot.lane.b32.xlu1 %v2760_v21, %s2761_s23  ;;  %v1991_v21 = vmul.f32 %v3225_v43, %v2902_v59  ;;  %v2018_v59 = vmul.f32 %v3225_v43, %v2924_v14  ;;  %v2692_v14 = vpack.c.bf16 %v2069_v8, %v2068_v61 }
 0x3cc   : > { %v2686_v49 = vpack.c.bf16 %v1991_v21, %v1990_v44  ;;  %v2688_v29 = vpack.c.bf16 %v2018_v59, %v2017_v56 }
 0x3cd   : > { %1966 = vrot.lane.b32.xlu0 %v2683_v32, %s2756_s19 }
 0x3ce   : > { %1861 = vrot.lane.b32.xlu1 %v2971_v53, %s2753_s13 }
 0x3d1   : > { %1781 = vrot.lane.b32.xlu0 %v2669_v42, %s2754_s14 }
 0x3d2   : > { %2084 = vrot.lane.b32.xlu1 %v2971_v53, %s2753_s13  ;;  %v1845_v53 = vmul.f32 %v2949_v36, %v3210_v35 }
 0x3d4   : > { %v2675_v62 = vpack.c.bf16 %v1846_v30, %v1845_v53 }
 0x3d5   : > { %2004 = vrot.lane.b32.xlu0 %v2686_v49, %s2754_s14 }
 0x3d9   : > { %1808 = vrot.lane.b32.xlu0 %v2671_v22, %s2755_s18 }
 0x3dd   : > { %2031 = vrot.lane.b32.xlu0 %v2688_v29, %s2755_s18 }
 0x3e1   : > { %1859 = vrot.lane.b32.xlu0 %v2675_v62, %s2753_s13 }
 0x3e5   : > { %2082 = vrot.lane.b32.xlu0 %v2692_v14, %s2753_s13 }
 0x41b   : > { %v1690_v41 = vpop.permute.xlu0 %1689 }
 0x41c   : > { %v1693_v46 = vrot.slane %v1690_v41, 4  ;;  %v1692_v36 = vpop.permute.xlu1 %1691 }
 0x41d   : > { %v1694_v47 = vrot.slane %v1692_v36, 4 }
 0x41f   : > { %v1695_v45 = vsel %vm246_vm1, %v1693_v46, %v1694_v47  ;;  %v1913_v48 = vpop.permute.xlu0 %1912 }
 0x420   : > { %v1696_v1 = vsel %vm273_vm2, %v1690_v41, %v1695_v45  ;;  %v1916_v12 = vrot.slane %v1913_v48, 4  ;;  %v1915_v15 = vpop.permute.xlu1 %1914 }
 0x421   : > { %v1917_v16 = vrot.slane %v1915_v15, 4 }
 0x423   : > { %v1918_v60 = vsel %vm246_vm1, %v1916_v12, %v1917_v16  ;;  %v1833_v5 = vpop.permute.xlu0 %1832 }
 0x424   : > { %v1919_v38 = vsel %vm273_vm2, %v1913_v48, %v1918_v60  ;;  %v1836_v54 = vrot.slane %v1833_v5, 4  ;;  %v1668_v55 = vpop.permute.xlu1 %1667 }
 0x425   : > { %v1670_v11 = vrot.slane %v1668_v55, 4 }
 0x426   : > { %v1838_v24 = vsel %vm246_vm1, %v1836_v54, %v1837_v58  ;;  %v1786_v54 = vrot.slane %v3320_v31, 4 }
 0x427   : > { %v3334_v20 = vsel %vm459_vm3, %v1833_v5, %v1838_v24  ;;  %v2056_v6 = vpop.permute.xlu0 %2055 }
 0x428   : > { %v1891_v3 = vpop.permute.xlu1 %1890  ;;  %v2059_v36 = vrot.slane %v2056_v6, 4 }
 0x429   : > { %v1893_v18 = vrot.slane %v1891_v3, 4 }
 0x42b   : > { %v1666_v9 = vpop.permute.xlu0 %1665 }
 0x42c   : > { %v1669_v39 = vrot.slane %v1666_v9, 4  ;;  %v1719_v27 = vpop.permute.xlu1 %1718 }
 0x42d   : > { %v1721_v42 = vrot.slane %v1719_v27, 4 }
 0x42e   : > { %v1671_v7 = vsel %vm246_vm1, %v1669_v39, %v1670_v11 }
 0x42f   : > { %v1672_v2 = vsel %vm248_vm0, %v1666_v9, %v1671_v7  ;;  %v1889_v28 = vpop.permute.xlu0 %1888 }
 0x430   : > { %v1892_v34 = vrot.slane %v1889_v28, 4  ;;  %v1746_v52 = vpop.permute.xlu1 %1745  ;;  %v2564_v19 = vcombine.low %v1672_v2, %v1696_v1  ;;  %v2565_v23 = vcombine.high %v1672_v2, %v1696_v1 }
 0x431   : > { %v1748_v59 = vrot.slane %v1746_v52, 4 }
 0x432   : > { %v1894_v32 = vsel %vm246_vm1, %v1892_v34, %v1893_v18  ;;  %2225 = vmatprep.subr.bf16.mxu0 %v2565_v23  ;;  %v1813_v34 = vrot.slane %v3324_v4, 4 }
 0x433   : > { %v1895_v40 = vsel %vm248_vm0, %v1889_v28, %v1894_v32  ;;  %v1717_v10 = vpop.permute.xlu0 %1716  ;;  %2226 = vmatpush1.bf16.msra.mxu0 %v2564_v19 }
 0x434   : > { %v1720_v44 = vrot.slane %v1717_v10, 4  ;;  %v1942_v21 = vpop.permute.xlu1 %1941  ;;  %v2566_v49 = vcombine.low %v1895_v40, %v1919_v38  ;;  %v2567_v25 = vcombine.high %v1895_v40, %v1919_v38 }
 0x435   : > { %v1944_v8 = vrot.slane %v1942_v21, 4 }
 0x436   : > { %v1722_v26 = vsel %vm246_vm1, %v1720_v44, %v1721_v42  ;;  %2266 = vmatprep.subr.bf16.mxu1 %v2567_v25 }
 0x437   : > { %v1723_v22 = vsel %vm312_vm8, %v1717_v10, %v1722_v26  ;;  %v1744_v56 = vpop.permute.xlu0 %1743  ;;  %2267 = vmatpush1.bf16.msra.mxu1 %v2566_v49  ;;  %v2036_v10 = vrot.slane %v3326_v63, 4 }
 0x438   : > { %v1747_v29 = vrot.slane %v1744_v56, 4  ;;  %v1969_v53 = vpop.permute.xlu1 %1968 }
 0x439   : > { %v1971_v15 = vrot.slane %v1969_v53, 4 }
 0x43a   : > { %v1749_v30 = vsel %vm246_vm1, %v1747_v29, %v1748_v59  ;;  %v2112_v29 = vld [vmem:[#allocation3 + $0x90] sm:$0x11] }
 0x43b   : > { %v1750_v62 = vsel %vm349_vm7, %v1744_v56, %v1749_v30  ;;  %v1940_v61 = vpop.permute.xlu0 %1939 }
 0x43c   : > { %v1943_v14 = vrot.slane %v1940_v61, 4  ;;  %v2058_v13 = vpop.permute.xlu1 %2057  ;;  %v2568_v41 = vcombine.low %v1723_v22, %v1750_v62  ;;  %v2569_v46 = vcombine.high %v1723_v22, %v1750_v62 }
 0x43d   : > { %v2060_v47 = vrot.slane %v2058_v13, 4 }
 0x43e   : > { %v1945_v45 = vsel %vm246_vm1, %v1943_v14, %v1944_v8  ;;  %2227 = vmatprep.subr.bf16.mxu0 %v2569_v46  ;;  %v2113_v14 = vld [vmem:[#allocation3 + $0x98] sm:$0x11] }
 0x43f   : > { %v1946_v48 = vsel %vm312_vm8, %v1940_v61, %v1945_v45  ;;  %v2061_v1 = vsel %vm246_vm1, %v2059_v36, %v2060_v47  ;;  %v1967_v12 = vpop.permute.xlu0 %1966  ;;  %2228 = vmatpush1.bf16.msra.mxu0 %v2568_v41 }
 0x440   : > { %v2062_v16 = vsel %vm459_vm3, %v2056_v6, %v2061_v1  ;;  %v1970_v58 = vrot.slane %v1967_v12, 4  ;;  %v2009_v6 = vrot.slane %v3322_v33, 4  ;;  %v1862_v32 = vpop.permute.xlu1 %1861 }
 0x441   : > { %v1864_v25 = vrot.slane %v1862_v32, 4 }
 0x442   : > { %v1972_v60 = vsel %vm246_vm1, %v1970_v58, %v1971_v15 }
 0x443   : > { %v1973_v5 = vsel %vm349_vm7, %v1967_v12, %v1972_v60  ;;  %v1782_v38 = vpop.permute.xlu0 %1781 }
 0x444   : > { %v1785_v55 = vrot.slane %v1782_v38, 4  ;;  %v2570_v24 = vcombine.low %v1946_v48, %v1973_v5  ;;  %v2571_v3 = vcombine.high %v1946_v48, %v1973_v5  ;;  %v2085_v59 = vpop.permute.xlu1 %2084  ;;  %v2563_v48 = vld [vmem:[%s3399_s1 + $0x8] sm:$0xf] }
 0x446   : > { %v1787_v9 = vsel %vm246_vm1, %v1785_v55, %v1786_v54  ;;  %2268 = vmatprep.subr.bf16.mxu1 %v2571_v3  ;;  %v2328_v55 = vshrl.u32 %v169_v0, 7 }
 0x447   : > { %v1788_v11 = vsel %vm323_vm6, %v1782_v38, %v1787_v9  ;;  %v2005_v39 = vpop.permute.xlu0 %2004  ;;  %2269 = vmatpush1.bf16.msra.mxu1 %v2570_v24 }
 0x448   : > { %v2008_v27 = vrot.slane %v2005_v39, 4  ;;  %v2572_v7 = vcombine.low %v3220_v50, %v1788_v11  ;;  %v2573_v2 = vcombine.high %v3220_v50, %v1788_v11 }
 0x44a   : > { %v2010_v28 = vsel %vm246_vm1, %v2008_v27, %v2009_v6  ;;  %2229 = vmatprep.subr.bf16.mxu0 %v2573_v2 }
 0x44b   : > { %v2011_v31 = vsel %vm323_vm6, %v2005_v39, %v2010_v28  ;;  %v1809_v18 = vpop.permute.xlu0 %1808  ;;  %2230 = vmatpush1.bf16.msra.mxu0 %v2572_v7 }
 0x44c   : > { %v1812_v52 = vrot.slane %v1809_v18, 4  ;;  %v2574_v19 = vcombine.low %v3236_v17, %v2011_v31  ;;  %v2575_v23 = vcombine.high %v3236_v17, %v2011_v31 }
 0x44e   : > { %v1814_v33 = vsel %vm246_vm1, %v1812_v52, %v1813_v34  ;;  %2270 = vmatprep.subr.bf16.mxu1 %v2575_v23 }
 0x44f   : > { %v1815_v50 = vsel %vm286_vm5, %v1809_v18, %v1814_v33  ;;  %v2032_v40 = vpop.permute.xlu0 %2031  ;;  %2271 = vmatpush1.bf16.msra.mxu1 %v2574_v19 }
 0x450   : > { %v2035_v42 = vrot.slane %v2032_v40, 4  ;;  %v2576_v44 = vcombine.low %v1815_v50, %v3334_v20  ;;  %v2577_v4 = vcombine.high %v1815_v50, %v3334_v20  ;;  %v2087_v20 = vrot.slane %v2085_v59, 4 }
 0x452   : > { %v2037_v21 = vsel %vm246_vm1, %v2035_v42, %v2036_v10  ;;  %2231 = vmatprep.subr.bf16.mxu0 %v2577_v4 }
 0x453   : > { %v2038_v17 = vsel %vm286_vm5, %v2032_v40, %v2037_v21  ;;  %v1860_v49 = vpop.permute.xlu0 %1859  ;;  %2232 = vmatpush1.bf16.msra.mxu0 %v2576_v44 }
 0x454   : > { %v1863_v26 = vrot.slane %v1860_v49, 4  ;;  %v2578_v22 = vcombine.low %v2038_v17, %v2062_v16  ;;  %v2579_v56 = vcombine.high %v2038_v17, %v2062_v16 }
 0x456   : > { %v1865_v63 = vsel %vm246_vm1, %v1863_v26, %v1864_v25  ;;  %2272 = vmatprep.subr.bf16.mxu1 %v2579_v56 }
 0x457   : > { %v1866_v53 = vsel %vm221_vm4, %v1860_v49, %v1865_v63  ;;  %v2083_v30 = vpop.permute.xlu0 %2082  ;;  %2273 = vmatpush1.bf16.msra.mxu1 %v2578_v22 }
 0x458   : > { %v2086_v62 = vrot.slane %v2083_v30, 4  ;;  %v2580_v61 = vcombine.low %v1866_v53, %v2112_v29  ;;  %v2581_v8 = vcombine.high %v1866_v53, %v2112_v29 }
 0x45a   : > { %v2088_v13 = vsel %vm246_vm1, %v2086_v62, %v2087_v20  ;;  %v2217_v41 = vand.u32 %v2581_v8, %v3047_v51  ;;  %v2214_v46 = vand.u32 %v2580_v61, %v3047_v51 }
 0x45b   : > { %v2089_v36 = vsel %vm221_vm4, %v2083_v30, %v2088_v13  ;;  %vm2329_vm4 = vcmp.lt.s32.totalorder %v2328_v55, 4 }
 0x45c   : > { %2233 = vmatprep.subr.bf16.mxu0 %v2217_v41  ;;  %v2582_v47 = vcombine.low %v2089_v36, %v2113_v14  ;;  %v2583_v45 = vcombine.high %v2089_v36, %v2113_v14 }
 0x45d   : > { %2234 = vmatpush1.bf16.msra.mxu0 %v2214_v46 }
 0x45e   : > { %v2223_v1 = vand.u32 %v2583_v45, %v3047_v51  ;;  %v2220_v12 = vand.u32 %v2582_v47, %v3047_v51 }
 0x460   : > { %2584 = vmatmul.mubr.msk.bf16.vlgmr.msra.gmra.mrb[8].mxu0 %vm843_vm10, %v2563_v48  ;;  %2274 = vmatprep.subr.bf16.mxu1 %v2223_v1 }
 0x461   : > { %2275 = vmatpush1.bf16.msra.mxu1 %v2220_v12 }
 0x464   : > { %2585 = vmatmul.mubr.msk.bf16.vlgmr.msra.gmra.mrb[8].mxu1 %vm843_vm10, %v2563_v48 }
 0x533   : > { %v2259_v15 = vpop.f32.mrb[8].mxu0 }
 0x534   : > { %v2307_v16 = vadd.f32 3.0, %v2259_v15  ;;  %v2261_v58 = vpop.f32.mrb[9].mxu0 }
 0x535   : > { %v2308_v60 = vadd.f32 3.0, %v2261_v58  ;;  %v2263_v5 = vpop.f32.mrb[10].mxu0 }
 0x536   : > { %v2311_v38 = vmax.f32 %v2307_v16, 0.0  ;;  %v2264_v54 = vpop.f32.mrb[11].mxu0 }
 0x537   : > { %v2312_v24 = vmax.f32 %v2308_v60, 0.0  ;;  %v2300_v3 = vpop.f32.mrb[8].mxu1 }
 0x538   : > { %v2315_v9 = vmin.f32 %v2311_v38, 6.0  ;;  %v2309_v51 = vadd.f32 3.0, %v2300_v3  ;;  %v2302_v11 = vpop.f32.mrb[9].mxu1 }
 0x539   : > { %v2316_v39 = vmin.f32 %v2312_v24, 6.0  ;;  %v2310_v6 = vadd.f32 3.0, %v2302_v11  ;;  %v2304_v27 = vpop.f32.mrb[10].mxu1 }
 0x53a   : > { %v2319_v7 = vmul.f32 %v2315_v9, %v2259_v15  ;;  %v2313_v2 = vmax.f32 %v2309_v51, 0.0  ;;  %v2305_v28 = vpop.f32.mrb[11].mxu1 }
 0x53b   : > { %v2320_v31 = vmul.f32 %v2316_v39, %v2261_v58  ;;  %v2314_v18 = vmax.f32 %v2310_v6, 0.0 }
 0x53c   : > { %v2323_v0 = vmul.f32 0.16666667, %v2319_v7  ;;  %v2317_v34 = vmin.f32 %v2313_v2, 6.0 }
 0x53d   : > { %v2324_v52 = vmul.f32 0.16666667, %v2320_v31  ;;  %v2318_v19 = vmin.f32 %v2314_v18, 6.0 }
 0x53e   : > { %v2332_v23 = vsel %vm2329_vm4, %v3210_v35, %v2323_v0  ;;  %v2321_v33 = vmul.f32 %v2317_v34, %v2300_v3 }
 0x53f   : > { %2336 = vst [vmem:[%s150_s4] sm:$0xff] %v2332_v23  ;;  %v2333_v32 = vsel %vm2329_vm4, %v3212_v37, %v2324_v52  ;;  %v2322_v50 = vmul.f32 %v2318_v19, %v2302_v11 }
 0x540   : > { %2337 = vst [vmem:[%s150_s4 + $0x8] sm:$0xff] %v2333_v32  ;;  %v2325_v40 = vmul.f32 0.16666667, %v2321_v33 }
 0x541   : > { %v2326_v10 = vmul.f32 0.16666667, %v2322_v50 }
 0x542   : > { %v2334_v42 = vsel %vm2329_vm4, %v3222_v57, %v2325_v40 }
 0x543   : > { %2586 = vst [vmem:[%s150_s4 + $0x10] sm:$0xff] %v2334_v42  ;;  %v2335_v44 = vsel %vm2329_vm4, %v3225_v43, %v2326_v10 }
 0x544   : > { %2587 = vst [vmem:[%s150_s4 + $0x18] sm:$0xff] %v2335_v44 }
 0x545 PF: > { %s12_s9 = sadd.s32 1, %s2750_s9  }
 0x546   : > { %p9_p4 = scmp.ge.s32.totalorder %s12_s9, 4  }
 0x548   :  { %11 = sbr.rel (!%p9_p4) target bundleno = 1 (0x1), region = 62 }

</bundles_post_ra>
